<compile_context>
chip_gen: v5e
topology: v5e:2x2
jax: 0.10.0
libtpu: 0.0.40
codegen_flags: <defaults>
</compile_context>

<pallas_src>
import functools
import math

import jax
import jax.numpy as jnp
from jax.experimental import pallas as pl
from jax.experimental.pallas import tpu as pltpu

LN_EPS = 1e-6  # timm ViT default; PyTorch nn.LayerNorm default would be 1e-5.


# ---------------------------------------------------------------------------
# In-kernel helpers (traced inside the Pallas kernel only)
# ---------------------------------------------------------------------------
def _erf(x):
    # Abramowitz & Stegun 7.1.26 rational approximation (|err| < 1.5e-7 ~ f32
    # round-off) so exact (erf-based) nn.GELU lowers with plain VPU/EUP ops.
    a1, a2, a3, a4, a5 = 0.254829592, -0.284496736, 1.421413741, -1.453152027, 1.061405429
    p = 0.3275911
    s = jnp.where(x >= 0.0, 1.0, -1.0)
    z = jnp.abs(x)
    t = 1.0 / (1.0 + p * z)
    poly = ((((a5 * t + a4) * t + a3) * t + a2) * t + a1) * t
    return s * (1.0 - poly * jnp.exp(-z * z))


def _gelu_exact(x):
    return 0.5 * x * (1.0 + _erf(x * (1.0 / math.sqrt(2.0))))


def _layernorm(x, g, b):
    mu = jnp.mean(x, axis=-1, keepdims=True)
    var = jnp.mean((x - mu) ** 2, axis=-1, keepdims=True)
    return (x - mu) * jax.lax.rsqrt(var + LN_EPS) * g + b


# ---------------------------------------------------------------------------
# Fused kernel: embed -> [L transformer blocks] -> pool -> fc_norm -> head -> projector
# grid = (num_layer,); per-layer weights streamed, residual stream in VMEM scratch.
# ---------------------------------------------------------------------------
def _fused_encoder_kernel(
    x_ref, w_emb_ref, b_emb_ref, pos_ref, cls_ref,
    ln1g_ref, ln1b_ref, wqkv_ref, bqkv_ref, wo_ref, bo_ref,
    ln2g_ref, ln2b_ref, wfc1_ref, bfc1_ref, wfc2_ref, bfc2_ref,
    fcng_ref, fcnb_ref, whead_ref, bhead_ref, wproj_ref, bproj_ref,
    feats_ref, proj_ref,
    h_sc, ctx_sc, pool_sc,
    *, num_heads):
    layer = pl.program_id(0)
    n_layers = pl.num_programs(0)
    B, T, _ = x_ref.shape
    _, D = h_sc.shape
    N = T + 1                         # tokens per sequence; cls token stored LAST
    hd = D // num_heads
    scale = 1.0 / math.sqrt(hd)
    bf16 = jnp.bfloat16
    f32 = jnp.float32

    # ---- prologue (first grid step): token embed + positional embed + cls token ----
    @pl.when(layer == 0)
    def _prologue():
        w_e = w_emb_ref[...]                                    # (Cin, D) bf16
        for b in range(B):                                      # static unroll (small B)
            tok = (jnp.dot(x_ref[b].astype(bf16), w_e, preferred_element_type=f32)
                   + b_emb_ref[...] + pos_ref[...])             # (T, D) f32
            h_sc[pl.ds(b * N, T), :] = tok
            h_sc[pl.ds(b * N + T, 1), :] = cls_ref[...]         # cls (+ its pos) goes last

    # ---- pre-LN transformer block for this layer (QKV packed [Q;K;V], heads contiguous) ----
    h = h_sc[...]                                               # (B*N, D) f32 residual stream

    hn = _layernorm(h, ln1g_ref[0], ln1b_ref[0])
    qkv = (jnp.dot(hn.astype(bf16), wqkv_ref[0], preferred_element_type=f32)
           + bqkv_ref[0])                                       # (B*N, 3D) f32
    for b in range(B):                                          # static unroll over batch & heads
        qkv_b = qkv[b * N:(b + 1) * N, :]                       # (N, 3D)
        for hh in range(num_heads):
            q = qkv_b[:, hh * hd:(hh + 1) * hd].astype(bf16)
            k = qkv_b[:, D + hh * hd:D + (hh + 1) * hd].astype(bf16)
            v = qkv_b[:, 2 * D + hh * hd:2 * D + (hh + 1) * hd].astype(bf16)
            s = jax.lax.dot_general(q, k, (((1,), (1,)), ((), ())),
                                    preferred_element_type=f32) * scale
            s = s - jnp.max(s, axis=-1, keepdims=True)
            p = jnp.exp(s)
            p = p * pl.reciprocal(jnp.sum(p, axis=-1, keepdims=True), approx=True)
            # write this head's context at its static column offset (no concat)
            ctx_sc[pl.ds(b * N, N), hh * hd:(hh + 1) * hd] = jnp.dot(
                p.astype(bf16), v, preferred_element_type=f32)
    attn = (jnp.dot(ctx_sc[...].astype(bf16), wo_ref[0], preferred_element_type=f32)
            + bo_ref[0])
    h = h + attn

    hn2 = _layernorm(h, ln2g_ref[0], ln2b_ref[0])
    m = (jnp.dot(hn2.astype(bf16), wfc1_ref[0], preferred_element_type=f32)
         + bfc1_ref[0])
    m = _gelu_exact(m)
    m = (jnp.dot(m.astype(bf16), wfc2_ref[0], preferred_element_type=f32)
         + bfc2_ref[0])
    h = h + m
    h_sc[...] = h

    # ---- epilogue (last grid step): avg-pool (non-cls) -> fc_norm -> head -> projector ----
    @pl.when(layer == n_layers - 1)
    def _epilogue():
        inv_t = 1.0 / T
        for b in range(B):
            tok_b = h[b * N:b * N + T, :]                       # non-cls tokens (aligned slice)
            pool_sc[pl.ds(b, 1), :] = jnp.sum(tok_b, axis=0, keepdims=True) * inv_t
        pooled = _layernorm(pool_sc[...], fcng_ref[...], fcnb_ref[...])
        feats = (jnp.dot(pooled.astype(bf16), whead_ref[...], preferred_element_type=f32)
                 + bhead_ref[...])
        feats_ref[...] = feats.astype(feats_ref.dtype)
        proj = (jnp.dot(feats.astype(bf16), wproj_ref[...], preferred_element_type=f32)
                + bproj_ref[...])
        proj_ref[...] = proj.astype(proj_ref.dtype)


# ---------------------------------------------------------------------------
# Host-side packing: stack per-layer weights, bf16 matrices, cls-token-last pos.
# ---------------------------------------------------------------------------
def _pack_params(params):
    D = params['w_embed'].shape[1]
    bf16 = jnp.bfloat16

    def stack(key):
        return jnp.stack([lp[key] for lp in params['layers']], axis=0)

    pos = params['pos_embed'][0]                                # (N, D)
    cls_pos = (params['cls_token'][0, 0] + pos[0]).reshape(1, D)
    pos_tok = pos[1:]                                           # (T, D) — non-cls rows

    return dict(
        w_embed=params['w_embed'].astype(bf16),
        b_embed=params['b_embed'].reshape(1, D),
        pos_tok=pos_tok,
        cls_pos=cls_pos,
        ln1_g=stack('ln1_g')[:, None, :], ln1_b=stack('ln1_b')[:, None, :],
        w_qkv=stack('w_qkv').astype(bf16), b_qkv=stack('b_qkv')[:, None, :],
        w_o=stack('w_o').astype(bf16), b_o=stack('b_o')[:, None, :],
        ln2_g=stack('ln2_g')[:, None, :], ln2_b=stack('ln2_b')[:, None, :],
        w_fc1=stack('w_fc1').astype(bf16), b_fc1=stack('b_fc1')[:, None, :],
        w_fc2=stack('w_fc2').astype(bf16), b_fc2=stack('b_fc2')[:, None, :],
        fcn_g=params['fc_norm_g'].reshape(1, D),
        fcn_b=params['fc_norm_b'].reshape(1, D),
        w_head=params['w_head'].astype(bf16),
        b_head=params['b_head'].reshape(1, -1),
        w_proj=params['w_proj'].astype(bf16),
        b_proj=params['b_proj'].reshape(1, -1),
    )


# ---------------------------------------------------------------------------
# Parameter init (deterministic, synthetic) + full forward
# ---------------------------------------------------------------------------
def init_params(key, num_inputs, d_model, num_layer, mlp_dim, num_days):
    keys = jax.random.split(key, 8 + num_layer)

    def nrm(k, shape, std=0.02):
        return (std * jax.random.normal(k, shape)).astype(jnp.float32)

    D = d_model
    Dh = 4 * D  # standard ViT mlp_ratio=4
    params = {
        'w_embed': nrm(keys[0], (num_inputs, D)),
        'b_embed': jnp.zeros((D,), jnp.float32),
        'cls_token': nrm(keys[1], (1, 1, D)),
        'pos_embed': nrm(keys[2], (1, num_days + 1, D)),
        'fc_norm_g': jnp.ones((D,), jnp.float32),
        'fc_norm_b': jnp.zeros((D,), jnp.float32),
        'w_head': nrm(keys[3], (D, mlp_dim)),
        'b_head': jnp.zeros((mlp_dim,), jnp.float32),
        'w_proj': nrm(keys[4], (mlp_dim, mlp_dim)),
        'b_proj': jnp.zeros((mlp_dim,), jnp.float32),
        'layers': [],
    }
    for l in range(num_layer):
        lk = jax.random.split(keys[8 + l], 4)
        params['layers'].append({
            'ln1_g': jnp.ones((D,), jnp.float32), 'ln1_b': jnp.zeros((D,), jnp.float32),
            'w_qkv': nrm(lk[0], (D, 3 * D)), 'b_qkv': jnp.zeros((3 * D,), jnp.float32),
            'w_o': nrm(lk[1], (D, D)), 'b_o': jnp.zeros((D,), jnp.float32),
            'ln2_g': jnp.ones((D,), jnp.float32), 'ln2_b': jnp.zeros((D,), jnp.float32),
            'w_fc1': nrm(lk[2], (D, Dh)), 'b_fc1': jnp.zeros((Dh,), jnp.float32),
            'w_fc2': nrm(lk[3], (Dh, D)), 'b_fc2': jnp.zeros((D,), jnp.float32),
        })
    return params


def transformer_encoder_forward(x, params, num_heads):
    """x: (B, T, C_in) -> (features (B, mlp_dim), projected (B, mlp_dim))"""
    B, T, Cin = x.shape
    D = params['w_embed'].shape[1]
    Dh = params['layers'][0]['w_fc1'].shape[1]
    MLPd = params['w_head'].shape[1]
    L = len(params['layers'])
    N = T + 1
    assert D % num_heads == 0

    p = _pack_params(params)
    kern = functools.partial(_fused_encoder_kernel, num_heads=num_heads)

    c2 = lambda l: (0, 0)            # constant blocks: fetched once, stay resident
    c3 = lambda l: (0, 0, 0)
    lyr = lambda l: (l, 0, 0)        # per-layer blocks: streamed / double-buffered

    in_specs = [
        pl.BlockSpec((B, T, Cin), c3),          # x
        pl.BlockSpec((Cin, D), c2),             # w_embed (bf16)
        pl.BlockSpec((1, D), c2),               # b_embed
        pl.BlockSpec((T, D), c2),               # pos embed, non-cls rows
        pl.BlockSpec((1, D), c2),               # cls token + pos[0]
        pl.BlockSpec((1, 1, D), lyr),           # ln1 gamma
        pl.BlockSpec((1, 1, D), lyr),           # ln1 beta
        pl.BlockSpec((1, D, 3 * D), lyr),       # w_qkv (bf16)
        pl.BlockSpec((1, 1, 3 * D), lyr),       # b_qkv
        pl.BlockSpec((1, D, D), lyr),           # w_o (bf16)
        pl.BlockSpec((1, 1, D), lyr),           # b_o
        pl.BlockSpec((1, 1, D), lyr),           # ln2 gamma
        pl.BlockSpec((1, 1, D), lyr),           # ln2 beta
        pl.BlockSpec((1, D, Dh), lyr),          # w_fc1 (bf16)
        pl.BlockSpec((1, 1, Dh), lyr),          # b_fc1
        pl.BlockSpec((1, Dh, D), lyr),          # w_fc2 (bf16)
        pl.BlockSpec((1, 1, D), lyr),           # b_fc2
        pl.BlockSpec((1, D), c2),               # fc_norm gamma
        pl.BlockSpec((1, D), c2),               # fc_norm beta
        pl.BlockSpec((D, MLPd), c2),            # w_head (bf16)
        pl.BlockSpec((1, MLPd), c2),            # b_head
        pl.BlockSpec((MLPd, MLPd), c2),         # w_proj (bf16)
        pl.BlockSpec((1, MLPd), c2),            # b_proj
    ]
    out_specs = (pl.BlockSpec((B, MLPd), c2), pl.BlockSpec((B, MLPd), c2))
    out_shape = (jax.ShapeDtypeStruct((B, MLPd), jnp.float32),
                 jax.ShapeDtypeStruct((B, MLPd), jnp.float32))
    scratch = [pltpu.VMEM((B * N, D), jnp.float32),   # residual stream, persists across layers
               pltpu.VMEM((B * N, D), jnp.float32),   # per-head attention context
               pltpu.VMEM((B, D), jnp.float32)]       # pooled tokens

    feats, proj = pl.pallas_call(
        kern,
        out_shape=out_shape,
        grid=(L,),
        in_specs=in_specs,
        out_specs=out_specs,
        scratch_shapes=scratch,
        compiler_params=pltpu.CompilerParams(
            dimension_semantics=("arbitrary",),      # sequential over layers
            vmem_limit_bytes=32 * 1024 * 1024),
    )(x,
      p['w_embed'], p['b_embed'], p['pos_tok'], p['cls_pos'],
      p['ln1_g'], p['ln1_b'], p['w_qkv'], p['b_qkv'], p['w_o'], p['b_o'],
      p['ln2_g'], p['ln2_b'], p['w_fc1'], p['b_fc1'], p['w_fc2'], p['b_fc2'],
      p['fcn_g'], p['fcn_b'], p['w_head'], p['b_head'], p['w_proj'], p['b_proj'])
    return feats, proj


if __name__ == "__main__":
    # small shapes: batch=2, num_inputs=4 channels, num_days=8 timesteps,
    # d_model=32, n_head=4, num_layer=2, mlp_dim=32
    B, Cin, T = 2, 4, 8
    D, H, L, MLP = 32, 4, 2, 32

    key = jax.random.PRNGKey(0)
    pkey, xkey = jax.random.split(key)
    params = init_params(pkey, Cin, D, L, MLP, T)
    x = jax.random.normal(xkey, (B, T, Cin), dtype=jnp.float32)

    fwd = jax.jit(functools.partial(transformer_encoder_forward, num_heads=H))
    out, out_proj = fwd(x, params)
    jax.block_until_ready((out, out_proj))
    assert out.shape == (B, MLP) and out_proj.shape == (B, MLP)
    assert bool(jnp.all(jnp.isfinite(out))) and bool(jnp.all(jnp.isfinite(out_proj)))
    print("KERNEL_OK")
</pallas_src>

<mosaic_0001>
module attributes {stable_mosaic.version = 11 : i64} {
  func.func @_fused_encoder_kernel(%arg0: i32, %arg1: memref<2x8x4xf32, #tpu.memory_space<vmem>>, %arg2: memref<4x32xbf16, #tpu.memory_space<vmem>>, %arg3: memref<1x32xf32, #tpu.memory_space<vmem>>, %arg4: memref<8x32xf32, #tpu.memory_space<vmem>>, %arg5: memref<1x32xf32, #tpu.memory_space<vmem>>, %arg6: memref<1x1x32xf32, #tpu.memory_space<vmem>>, %arg7: memref<1x1x32xf32, #tpu.memory_space<vmem>>, %arg8: memref<1x32x96xbf16, #tpu.memory_space<vmem>>, %arg9: memref<1x1x96xf32, #tpu.memory_space<vmem>>, %arg10: memref<1x32x32xbf16, #tpu.memory_space<vmem>>, %arg11: memref<1x1x32xf32, #tpu.memory_space<vmem>>, %arg12: memref<1x1x32xf32, #tpu.memory_space<vmem>>, %arg13: memref<1x1x32xf32, #tpu.memory_space<vmem>>, %arg14: memref<1x32x128xbf16, #tpu.memory_space<vmem>>, %arg15: memref<1x1x128xf32, #tpu.memory_space<vmem>>, %arg16: memref<1x128x32xbf16, #tpu.memory_space<vmem>>, %arg17: memref<1x1x32xf32, #tpu.memory_space<vmem>>, %arg18: memref<1x32xf32, #tpu.memory_space<vmem>>, %arg19: memref<1x32xf32, #tpu.memory_space<vmem>>, %arg20: memref<32x32xbf16, #tpu.memory_space<vmem>>, %arg21: memref<1x32xf32, #tpu.memory_space<vmem>>, %arg22: memref<32x32xbf16, #tpu.memory_space<vmem>>, %arg23: memref<1x32xf32, #tpu.memory_space<vmem>>, %arg24: memref<2x32xf32, #tpu.memory_space<vmem>>, %arg25: memref<2x32xf32, #tpu.memory_space<vmem>>, %arg26: memref<18x32xf32, #tpu.memory_space<vmem>>, %arg27: memref<18x32xf32, #tpu.memory_space<vmem>>, %arg28: memref<2x32xf32, #tpu.memory_space<vmem>>) attributes {dimension_semantics = [#tpu.dimension_semantics<arbitrary>], iteration_bounds = array<i64: 2>, scalar_prefetch = 0 : i64, scratch_operands = 3 : i64, tpu.core_type = #tpu.core_type<tc>, window_params = [{pipeline_mode = #tpu.pipeline_mode<synchronous>, transform_indices = @transform_0, window_bounds = array<i64: 2, 8, 4>}, {pipeline_mode = #tpu.pipeline_mode<synchronous>, transform_indices = @transform_1, window_bounds = array<i64: 4, 32>}, {pipeline_mode = #tpu.pipeline_mode<synchronous>, transform_indices = @transform_2, window_bounds = array<i64: 1, 32>}, {pipeline_mode = #tpu.pipeline_mode<synchronous>, transform_indices = @transform_3, window_bounds = array<i64: 8, 32>}, {pipeline_mode = #tpu.pipeline_mode<synchronous>, transform_indices = @transform_4, window_bounds = array<i64: 1, 32>}, {transform_indices = @transform_5, window_bounds = array<i64: 1, 1, 32>}, {transform_indices = @transform_6, window_bounds = array<i64: 1, 1, 32>}, {transform_indices = @transform_7, window_bounds = array<i64: 1, 32, 96>}, {transform_indices = @transform_8, window_bounds = array<i64: 1, 1, 96>}, {transform_indices = @transform_9, window_bounds = array<i64: 1, 32, 32>}, {transform_indices = @transform_10, window_bounds = array<i64: 1, 1, 32>}, {transform_indices = @transform_11, window_bounds = array<i64: 1, 1, 32>}, {transform_indices = @transform_12, window_bounds = array<i64: 1, 1, 32>}, {transform_indices = @transform_13, window_bounds = array<i64: 1, 32, 128>}, {transform_indices = @transform_14, window_bounds = array<i64: 1, 1, 128>}, {transform_indices = @transform_15, window_bounds = array<i64: 1, 128, 32>}, {transform_indices = @transform_16, window_bounds = array<i64: 1, 1, 32>}, {pipeline_mode = #tpu.pipeline_mode<synchronous>, transform_indices = @transform_17, window_bounds = array<i64: 1, 32>}, {pipeline_mode = #tpu.pipeline_mode<synchronous>, transform_indices = @transform_18, window_bounds = array<i64: 1, 32>}, {pipeline_mode = #tpu.pipeline_mode<synchronous>, transform_indices = @transform_19, window_bounds = array<i64: 32, 32>}, {pipeline_mode = #tpu.pipeline_mode<synchronous>, transform_indices = @transform_20, window_bounds = array<i64: 1, 32>}, {pipeline_mode = #tpu.pipeline_mode<synchronous>, transform_indices = @transform_21, window_bounds = array<i64: 32, 32>}, {pipeline_mode = #tpu.pipeline_mode<synchronous>, transform_indices = @transform_22, window_bounds = array<i64: 1, 32>}, {pipeline_mode = #tpu.pipeline_mode<synchronous>, transform_indices = @transform_23, window_bounds = array<i64: 2, 32>}, {pipeline_mode = #tpu.pipeline_mode<synchronous>, transform_indices = @transform_24, window_bounds = array<i64: 2, 32>}]} {
    %c0_i32 = arith.constant 0 : i32
    %0 = arith.cmpi eq, %arg0, %c0_i32 : i32
    %1 = arith.extui %0 : i1 to i32
    %c0_i32_0 = arith.constant 0 : i32
    %2 = arith.cmpi ne, %1, %c0_i32_0 : i32
    scf.if %2 {
      %c0_124 = arith.constant 0 : index
      %c0_125 = arith.constant 0 : index
      %314 = vector.load %arg2[%c0_124, %c0_125] : memref<4x32xbf16, #tpu.memory_space<vmem>>, vector<4x32xbf16>
      %c0_126 = arith.constant 0 : index
      %c0_127 = arith.constant 0 : index
      %c0_128 = arith.constant 0 : index
      %315 = vector.load %arg1[%c0_126, %c0_127, %c0_128] : memref<2x8x4xf32, #tpu.memory_space<vmem>>, vector<1x8x4xf32>
      %316 = vector.shape_cast %315 : vector<1x8x4xf32> to vector<8x4xf32>
      %317 = arith.truncf %316 : vector<8x4xf32> to vector<8x4xbf16>
      %cst_129 = arith.constant dense<0.000000e+00> : vector<8x32xf32>
      %318 = tpu.matmul %317, %314, %cst_129 {dimension_numbers = #tpu.dot_dimension_numbers<[1], [0], [0], [1], [0, 0, 1, 1], [], []>} : vector<8x4xbf16>, vector<4x32xbf16>, vector<8x32xf32> -> vector<8x32xf32>
      %c0_130 = arith.constant 0 : index
      %c0_131 = arith.constant 0 : index
      %319 = vector.load %arg3[%c0_130, %c0_131] : memref<1x32xf32, #tpu.memory_space<vmem>>, vector<1x32xf32>
      %320 = vector.broadcast %319 : vector<1x32xf32> to vector<8x32xf32>
      %321 = arith.addf %318, %320 : vector<8x32xf32>
      %c0_132 = arith.constant 0 : index
      %c0_133 = arith.constant 0 : index
      %322 = vector.load %arg4[%c0_132, %c0_133] : memref<8x32xf32, #tpu.memory_space<vmem>>, vector<8x32xf32>
      %323 = arith.addf %321, %322 : vector<8x32xf32>
      %c0_134 = arith.constant 0 : index
      %c0_135 = arith.constant 0 : index
      %324 = vector.load %arg26[%c0_134, %c0_135] : memref<18x32xf32, #tpu.memory_space<vmem>>, vector<8x32xf32>
      tpu.vector_store %arg26[%c0_134, %c0_135], %323 {strides = array<i32>} : memref<18x32xf32, #tpu.memory_space<vmem>>, vector<8x32xf32>,
      %c0_136 = arith.constant 0 : index
      %c0_137 = arith.constant 0 : index
      %325 = vector.load %arg5[%c0_136, %c0_137] : memref<1x32xf32, #tpu.memory_space<vmem>>, vector<1x32xf32>
      %c8_138 = arith.constant 8 : index
      %c0_139 = arith.constant 0 : index
      %326 = vector.load %arg26[%c8_138, %c0_139] : memref<18x32xf32, #tpu.memory_space<vmem>>, vector<1x32xf32>
      tpu.vector_store %arg26[%c8_138, %c0_139], %325 {strides = array<i32>} : memref<18x32xf32, #tpu.memory_space<vmem>>, vector<1x32xf32>,
      %c1 = arith.constant 1 : index
      %c0_140 = arith.constant 0 : index
      %c0_141 = arith.constant 0 : index
      %327 = vector.load %arg1[%c1, %c0_140, %c0_141] : memref<2x8x4xf32, #tpu.memory_space<vmem>>, vector<1x8x4xf32>
      %328 = vector.shape_cast %327 : vector<1x8x4xf32> to vector<8x4xf32>
      %329 = arith.truncf %328 : vector<8x4xf32> to vector<8x4xbf16>
      %cst_142 = arith.constant dense<0.000000e+00> : vector<8x32xf32>
      %330 = tpu.matmul %329, %314, %cst_142 {dimension_numbers = #tpu.dot_dimension_numbers<[1], [0], [0], [1], [0, 0, 1, 1], [], []>} : vector<8x4xbf16>, vector<4x32xbf16>, vector<8x32xf32> -> vector<8x32xf32>
      %c0_143 = arith.constant 0 : index
      %c0_144 = arith.constant 0 : index
      %331 = vector.load %arg3[%c0_143, %c0_144] : memref<1x32xf32, #tpu.memory_space<vmem>>, vector<1x32xf32>
      %332 = vector.broadcast %331 : vector<1x32xf32> to vector<8x32xf32>
      %333 = arith.addf %330, %332 : vector<8x32xf32>
      %c0_145 = arith.constant 0 : index
      %c0_146 = arith.constant 0 : index
      %334 = vector.load %arg4[%c0_145, %c0_146] : memref<8x32xf32, #tpu.memory_space<vmem>>, vector<8x32xf32>
      %335 = arith.addf %333, %334 : vector<8x32xf32>
      %c9_147 = arith.constant 9 : index
      %c0_148 = arith.constant 0 : index
      %336 = vector.load %arg26[%c9_147, %c0_148] : memref<18x32xf32, #tpu.memory_space<vmem>>, vector<8x32xf32>
      tpu.vector_store %arg26[%c9_147, %c0_148], %335 {strides = array<i32>} : memref<18x32xf32, #tpu.memory_space<vmem>>, vector<8x32xf32>,
      %c0_149 = arith.constant 0 : index
      %c0_150 = arith.constant 0 : index
      %337 = vector.load %arg5[%c0_149, %c0_150] : memref<1x32xf32, #tpu.memory_space<vmem>>, vector<1x32xf32>
      %c17 = arith.constant 17 : index
      %c0_151 = arith.constant 0 : index
      %338 = vector.load %arg26[%c17, %c0_151] : memref<18x32xf32, #tpu.memory_space<vmem>>, vector<1x32xf32>
      tpu.vector_store %arg26[%c17, %c0_151], %337 {strides = array<i32>} : memref<18x32xf32, #tpu.memory_space<vmem>>, vector<1x32xf32>,
    } else {
    }
    %c0 = arith.constant 0 : index
    %c0_1 = arith.constant 0 : index
    %3 = vector.load %arg26[%c0, %c0_1] : memref<18x32xf32, #tpu.memory_space<vmem>>, vector<18x32xf32>
    %c0_2 = arith.constant 0 : index
    %c0_3 = arith.constant 0 : index
    %c0_4 = arith.constant 0 : index
    %4 = vector.load %arg6[%c0_2, %c0_3, %c0_4] : memref<1x1x32xf32, #tpu.memory_space<vmem>>, vector<1x1x32xf32>
    %5 = vector.shape_cast %4 : vector<1x1x32xf32> to vector<1x32xf32>
    %c0_5 = arith.constant 0 : index
    %c0_6 = arith.constant 0 : index
    %c0_7 = arith.constant 0 : index
    %6 = vector.load %arg7[%c0_5, %c0_6, %c0_7] : memref<1x1x32xf32, #tpu.memory_space<vmem>>, vector<1x1x32xf32>
    %7 = vector.shape_cast %6 : vector<1x1x32xf32> to vector<1x32xf32>
    %cst = arith.constant dense<0.000000e+00> : vector<18xf32>
    %8 = vector.multi_reduction <add>, %3, %cst [1] : vector<18x32xf32> to vector<18xf32>
    %9 = vector.shape_cast %8 : vector<18xf32> to vector<18x1xf32>
    %cst_8 = arith.constant 3.200000e+01 : f32
    %10 = vector.broadcast %cst_8 : f32 to vector<18x1xf32>
    %11 = arith.divf %9, %10 : vector<18x1xf32>
    %12 = vector.broadcast %11 : vector<18x1xf32> to vector<18x32xf32>
    %13 = arith.subf %3, %12 : vector<18x32xf32>
    %14 = arith.mulf %13, %13 : vector<18x32xf32>
    %cst_9 = arith.constant dense<0.000000e+00> : vector<18xf32>
    %15 = vector.multi_reduction <add>, %14, %cst_9 [1] : vector<18x32xf32> to vector<18xf32>
    %16 = vector.shape_cast %15 : vector<18xf32> to vector<18x1xf32>
    %cst_10 = arith.constant 3.200000e+01 : f32
    %17 = vector.broadcast %cst_10 : f32 to vector<18x1xf32>
    %18 = arith.divf %16, %17 : vector<18x1xf32>
    %19 = vector.broadcast %11 : vector<18x1xf32> to vector<18x32xf32>
    %20 = arith.subf %3, %19 : vector<18x32xf32>
    %cst_11 = arith.constant 9.99999997E-7 : f32
    %21 = vector.broadcast %cst_11 : f32 to vector<18x1xf32>
    %22 = arith.addf %18, %21 : vector<18x1xf32>
    %23 = math.rsqrt %22 : vector<18x1xf32>
    %24 = vector.broadcast %23 : vector<18x1xf32> to vector<18x32xf32>
    %25 = arith.mulf %20, %24 : vector<18x32xf32>
    %26 = vector.broadcast %5 : vector<1x32xf32> to vector<18x32xf32>
    %27 = arith.mulf %25, %26 : vector<18x32xf32>
    %28 = vector.broadcast %7 : vector<1x32xf32> to vector<18x32xf32>
    %29 = arith.addf %27, %28 : vector<18x32xf32>
    %30 = arith.truncf %29 : vector<18x32xf32> to vector<18x32xbf16>
    %c0_12 = arith.constant 0 : index
    %c0_13 = arith.constant 0 : index
    %c0_14 = arith.constant 0 : index
    %31 = vector.load %arg8[%c0_12, %c0_13, %c0_14] : memref<1x32x96xbf16, #tpu.memory_space<vmem>>, vector<1x32x96xbf16>
    %32 = vector.shape_cast %31 : vector<1x32x96xbf16> to vector<32x96xbf16>
    %cst_15 = arith.constant dense<0.000000e+00> : vector<18x96xf32>
    %33 = tpu.matmul %30, %32, %cst_15 {dimension_numbers = #tpu.dot_dimension_numbers<[1], [0], [0], [1], [0, 0, 1, 1], [], []>} : vector<18x32xbf16>, vector<32x96xbf16>, vector<18x96xf32> -> vector<18x96xf32>
    %c0_16 = arith.constant 0 : index
    %c0_17 = arith.constant 0 : index
    %c0_18 = arith.constant 0 : index
    %34 = vector.load %arg9[%c0_16, %c0_17, %c0_18] : memref<1x1x96xf32, #tpu.memory_space<vmem>>, vector<1x1x96xf32>
    %35 = vector.shape_cast %34 : vector<1x1x96xf32> to vector<1x96xf32>
    %36 = vector.broadcast %35 : vector<1x96xf32> to vector<18x96xf32>
    %37 = arith.addf %33, %36 : vector<18x96xf32>
    %38 = vector.extract_strided_slice %37 {offsets = [0, 0], sizes = [9, 96], strides = [1, 1]} : vector<18x96xf32> to vector<9x96xf32>
    %39 = vector.extract_strided_slice %38 {offsets = [0, 0], sizes = [9, 8], strides = [1, 1]} : vector<9x96xf32> to vector<9x8xf32>
    %40 = arith.truncf %39 : vector<9x8xf32> to vector<9x8xbf16>
    %41 = vector.extract_strided_slice %38 {offsets = [0, 32], sizes = [9, 8], strides = [1, 1]} : vector<9x96xf32> to vector<9x8xf32>
    %42 = arith.truncf %41 : vector<9x8xf32> to vector<9x8xbf16>
    %43 = vector.extract_strided_slice %38 {offsets = [0, 64], sizes = [9, 8], strides = [1, 1]} : vector<9x96xf32> to vector<9x8xf32>
    %44 = arith.truncf %43 : vector<9x8xf32> to vector<9x8xbf16>
    %cst_19 = arith.constant dense<0.000000e+00> : vector<9x9xf32>
    %45 = tpu.matmul %40, %42, %cst_19 {dimension_numbers = #tpu.dot_dimension_numbers<[1], [1], [0], [0], [0, 0, 1, 0], [], []>} : vector<9x8xbf16>, vector<9x8xbf16>, vector<9x9xf32> -> vector<9x9xf32>
    %cst_20 = arith.constant 0.353553385 : f32
    %46 = vector.broadcast %cst_20 : f32 to vector<9x9xf32>
    %47 = arith.mulf %45, %46 : vector<9x9xf32>
    %cst_21 = arith.constant dense<0xFF800000> : vector<9xf32>
    %48 = vector.multi_reduction <maximumf>, %47, %cst_21 [1] : vector<9x9xf32> to vector<9xf32>
    %49 = vector.shape_cast %48 : vector<9xf32> to vector<9x1xf32>
    %50 = vector.broadcast %49 : vector<9x1xf32> to vector<9x9xf32>
    %51 = arith.subf %47, %50 : vector<9x9xf32>
    %52 = math.exp %51 : vector<9x9xf32>
    %cst_22 = arith.constant dense<0.000000e+00> : vector<9xf32>
    %53 = vector.multi_reduction <add>, %52, %cst_22 [1] : vector<9x9xf32> to vector<9xf32>
    %54 = vector.shape_cast %53 : vector<9xf32> to vector<9x1xf32>
    %55 = tpu.reciprocal %54 {approx = true} : vector<9x1xf32> -> vector<9x1xf32>
    %56 = vector.broadcast %55 : vector<9x1xf32> to vector<9x9xf32>
    %57 = arith.mulf %52, %56 : vector<9x9xf32>
    %58 = arith.truncf %57 : vector<9x9xf32> to vector<9x9xbf16>
    %cst_23 = arith.constant dense<0.000000e+00> : vector<9x8xf32>
    %59 = tpu.matmul %58, %44, %cst_23 {dimension_numbers = #tpu.dot_dimension_numbers<[1], [0], [0], [1], [0, 0, 1, 1], [], []>} : vector<9x9xbf16>, vector<9x8xbf16>, vector<9x8xf32> -> vector<9x8xf32>
    %c0_24 = arith.constant 0 : index
    %c0_25 = arith.constant 0 : index
    %60 = vector.load %arg27[%c0_24, %c0_25] : memref<18x32xf32, #tpu.memory_space<vmem>>, vector<9x8xf32>
    tpu.vector_store %arg27[%c0_24, %c0_25], %59 {strides = array<i32>} : memref<18x32xf32, #tpu.memory_space<vmem>>, vector<9x8xf32>,
    %61 = vector.extract_strided_slice %38 {offsets = [0, 8], sizes = [9, 8], strides = [1, 1]} : vector<9x96xf32> to vector<9x8xf32>
    %62 = arith.truncf %61 : vector<9x8xf32> to vector<9x8xbf16>
    %63 = vector.extract_strided_slice %38 {offsets = [0, 40], sizes = [9, 8], strides = [1, 1]} : vector<9x96xf32> to vector<9x8xf32>
    %64 = arith.truncf %63 : vector<9x8xf32> to vector<9x8xbf16>
    %65 = vector.extract_strided_slice %38 {offsets = [0, 72], sizes = [9, 8], strides = [1, 1]} : vector<9x96xf32> to vector<9x8xf32>
    %66 = arith.truncf %65 : vector<9x8xf32> to vector<9x8xbf16>
    %cst_26 = arith.constant dense<0.000000e+00> : vector<9x9xf32>
    %67 = tpu.matmul %62, %64, %cst_26 {dimension_numbers = #tpu.dot_dimension_numbers<[1], [1], [0], [0], [0, 0, 1, 0], [], []>} : vector<9x8xbf16>, vector<9x8xbf16>, vector<9x9xf32> -> vector<9x9xf32>
    %cst_27 = arith.constant 0.353553385 : f32
    %68 = vector.broadcast %cst_27 : f32 to vector<9x9xf32>
    %69 = arith.mulf %67, %68 : vector<9x9xf32>
    %cst_28 = arith.constant dense<0xFF800000> : vector<9xf32>
    %70 = vector.multi_reduction <maximumf>, %69, %cst_28 [1] : vector<9x9xf32> to vector<9xf32>
    %71 = vector.shape_cast %70 : vector<9xf32> to vector<9x1xf32>
    %72 = vector.broadcast %71 : vector<9x1xf32> to vector<9x9xf32>
    %73 = arith.subf %69, %72 : vector<9x9xf32>
    %74 = math.exp %73 : vector<9x9xf32>
    %cst_29 = arith.constant dense<0.000000e+00> : vector<9xf32>
    %75 = vector.multi_reduction <add>, %74, %cst_29 [1] : vector<9x9xf32> to vector<9xf32>
    %76 = vector.shape_cast %75 : vector<9xf32> to vector<9x1xf32>
    %77 = tpu.reciprocal %76 {approx = true} : vector<9x1xf32> -> vector<9x1xf32>
    %78 = vector.broadcast %77 : vector<9x1xf32> to vector<9x9xf32>
    %79 = arith.mulf %74, %78 : vector<9x9xf32>
    %80 = arith.truncf %79 : vector<9x9xf32> to vector<9x9xbf16>
    %cst_30 = arith.constant dense<0.000000e+00> : vector<9x8xf32>
    %81 = tpu.matmul %80, %66, %cst_30 {dimension_numbers = #tpu.dot_dimension_numbers<[1], [0], [0], [1], [0, 0, 1, 1], [], []>} : vector<9x9xbf16>, vector<9x8xbf16>, vector<9x8xf32> -> vector<9x8xf32>
    %c0_31 = arith.constant 0 : index
    %c8 = arith.constant 8 : index
    %82 = vector.load %arg27[%c0_31, %c8] : memref<18x32xf32, #tpu.memory_space<vmem>>, vector<9x8xf32>
    tpu.vector_store %arg27[%c0_31, %c8], %81 {strides = array<i32>} : memref<18x32xf32, #tpu.memory_space<vmem>>, vector<9x8xf32>,
    %83 = vector.extract_strided_slice %38 {offsets = [0, 16], sizes = [9, 8], strides = [1, 1]} : vector<9x96xf32> to vector<9x8xf32>
    %84 = arith.truncf %83 : vector<9x8xf32> to vector<9x8xbf16>
    %85 = vector.extract_strided_slice %38 {offsets = [0, 48], sizes = [9, 8], strides = [1, 1]} : vector<9x96xf32> to vector<9x8xf32>
    %86 = arith.truncf %85 : vector<9x8xf32> to vector<9x8xbf16>
    %87 = vector.extract_strided_slice %38 {offsets = [0, 80], sizes = [9, 8], strides = [1, 1]} : vector<9x96xf32> to vector<9x8xf32>
    %88 = arith.truncf %87 : vector<9x8xf32> to vector<9x8xbf16>
    %cst_32 = arith.constant dense<0.000000e+00> : vector<9x9xf32>
    %89 = tpu.matmul %84, %86, %cst_32 {dimension_numbers = #tpu.dot_dimension_numbers<[1], [1], [0], [0], [0, 0, 1, 0], [], []>} : vector<9x8xbf16>, vector<9x8xbf16>, vector<9x9xf32> -> vector<9x9xf32>
    %cst_33 = arith.constant 0.353553385 : f32
    %90 = vector.broadcast %cst_33 : f32 to vector<9x9xf32>
    %91 = arith.mulf %89, %90 : vector<9x9xf32>
    %cst_34 = arith.constant dense<0xFF800000> : vector<9xf32>
    %92 = vector.multi_reduction <maximumf>, %91, %cst_34 [1] : vector<9x9xf32> to vector<9xf32>
    %93 = vector.shape_cast %92 : vector<9xf32> to vector<9x1xf32>
    %94 = vector.broadcast %93 : vector<9x1xf32> to vector<9x9xf32>
    %95 = arith.subf %91, %94 : vector<9x9xf32>
    %96 = math.exp %95 : vector<9x9xf32>
    %cst_35 = arith.constant dense<0.000000e+00> : vector<9xf32>
    %97 = vector.multi_reduction <add>, %96, %cst_35 [1] : vector<9x9xf32> to vector<9xf32>
    %98 = vector.shape_cast %97 : vector<9xf32> to vector<9x1xf32>
    %99 = tpu.reciprocal %98 {approx = true} : vector<9x1xf32> -> vector<9x1xf32>
    %100 = vector.broadcast %99 : vector<9x1xf32> to vector<9x9xf32>
    %101 = arith.mulf %96, %100 : vector<9x9xf32>
    %102 = arith.truncf %101 : vector<9x9xf32> to vector<9x9xbf16>
    %cst_36 = arith.constant dense<0.000000e+00> : vector<9x8xf32>
    %103 = tpu.matmul %102, %88, %cst_36 {dimension_numbers = #tpu.dot_dimension_numbers<[1], [0], [0], [1], [0, 0, 1, 1], [], []>} : vector<9x9xbf16>, vector<9x8xbf16>, vector<9x8xf32> -> vector<9x8xf32>
    %c0_37 = arith.constant 0 : index
    %c16 = arith.constant 16 : index
    %104 = vector.load %arg27[%c0_37, %c16] : memref<18x32xf32, #tpu.memory_space<vmem>>, vector<9x8xf32>
    tpu.vector_store %arg27[%c0_37, %c16], %103 {strides = array<i32>} : memref<18x32xf32, #tpu.memory_space<vmem>>, vector<9x8xf32>,
    %105 = vector.extract_strided_slice %38 {offsets = [0, 24], sizes = [9, 8], strides = [1, 1]} : vector<9x96xf32> to vector<9x8xf32>
    %106 = arith.truncf %105 : vector<9x8xf32> to vector<9x8xbf16>
    %107 = vector.extract_strided_slice %38 {offsets = [0, 56], sizes = [9, 8], strides = [1, 1]} : vector<9x96xf32> to vector<9x8xf32>
    %108 = arith.truncf %107 : vector<9x8xf32> to vector<9x8xbf16>
    %109 = vector.extract_strided_slice %38 {offsets = [0, 88], sizes = [9, 8], strides = [1, 1]} : vector<9x96xf32> to vector<9x8xf32>
    %110 = arith.truncf %109 : vector<9x8xf32> to vector<9x8xbf16>
    %cst_38 = arith.constant dense<0.000000e+00> : vector<9x9xf32>
    %111 = tpu.matmul %106, %108, %cst_38 {dimension_numbers = #tpu.dot_dimension_numbers<[1], [1], [0], [0], [0, 0, 1, 0], [], []>} : vector<9x8xbf16>, vector<9x8xbf16>, vector<9x9xf32> -> vector<9x9xf32>
    %cst_39 = arith.constant 0.353553385 : f32
    %112 = vector.broadcast %cst_39 : f32 to vector<9x9xf32>
    %113 = arith.mulf %111, %112 : vector<9x9xf32>
    %cst_40 = arith.constant dense<0xFF800000> : vector<9xf32>
    %114 = vector.multi_reduction <maximumf>, %113, %cst_40 [1] : vector<9x9xf32> to vector<9xf32>
    %115 = vector.shape_cast %114 : vector<9xf32> to vector<9x1xf32>
    %116 = vector.broadcast %115 : vector<9x1xf32> to vector<9x9xf32>
    %117 = arith.subf %113, %116 : vector<9x9xf32>
    %118 = math.exp %117 : vector<9x9xf32>
    %cst_41 = arith.constant dense<0.000000e+00> : vector<9xf32>
    %119 = vector.multi_reduction <add>, %118, %cst_41 [1] : vector<9x9xf32> to vector<9xf32>
    %120 = vector.shape_cast %119 : vector<9xf32> to vector<9x1xf32>
    %121 = tpu.reciprocal %120 {approx = true} : vector<9x1xf32> -> vector<9x1xf32>
    %122 = vector.broadcast %121 : vector<9x1xf32> to vector<9x9xf32>
    %123 = arith.mulf %118, %122 : vector<9x9xf32>
    %124 = arith.truncf %123 : vector<9x9xf32> to vector<9x9xbf16>
    %cst_42 = arith.constant dense<0.000000e+00> : vector<9x8xf32>
    %125 = tpu.matmul %124, %110, %cst_42 {dimension_numbers = #tpu.dot_dimension_numbers<[1], [0], [0], [1], [0, 0, 1, 1], [], []>} : vector<9x9xbf16>, vector<9x8xbf16>, vector<9x8xf32> -> vector<9x8xf32>
    %c0_43 = arith.constant 0 : index
    %c24 = arith.constant 24 : index
    %126 = vector.load %arg27[%c0_43, %c24] : memref<18x32xf32, #tpu.memory_space<vmem>>, vector<9x8xf32>
    tpu.vector_store %arg27[%c0_43, %c24], %125 {strides = array<i32>} : memref<18x32xf32, #tpu.memory_space<vmem>>, vector<9x8xf32>,
    %127 = vector.extract_strided_slice %37 {offsets = [9, 0], sizes = [9, 96], strides = [1, 1]} : vector<18x96xf32> to vector<9x96xf32>
    %128 = vector.extract_strided_slice %127 {offsets = [0, 0], sizes = [9, 8], strides = [1, 1]} : vector<9x96xf32> to vector<9x8xf32>
    %129 = arith.truncf %128 : vector<9x8xf32> to vector<9x8xbf16>
    %130 = vector.extract_strided_slice %127 {offsets = [0, 32], sizes = [9, 8], strides = [1, 1]} : vector<9x96xf32> to vector<9x8xf32>
    %131 = arith.truncf %130 : vector<9x8xf32> to vector<9x8xbf16>
    %132 = vector.extract_strided_slice %127 {offsets = [0, 64], sizes = [9, 8], strides = [1, 1]} : vector<9x96xf32> to vector<9x8xf32>
    %133 = arith.truncf %132 : vector<9x8xf32> to vector<9x8xbf16>
    %cst_44 = arith.constant dense<0.000000e+00> : vector<9x9xf32>
    %134 = tpu.matmul %129, %131, %cst_44 {dimension_numbers = #tpu.dot_dimension_numbers<[1], [1], [0], [0], [0, 0, 1, 0], [], []>} : vector<9x8xbf16>, vector<9x8xbf16>, vector<9x9xf32> -> vector<9x9xf32>
    %cst_45 = arith.constant 0.353553385 : f32
    %135 = vector.broadcast %cst_45 : f32 to vector<9x9xf32>
    %136 = arith.mulf %134, %135 : vector<9x9xf32>
    %cst_46 = arith.constant dense<0xFF800000> : vector<9xf32>
    %137 = vector.multi_reduction <maximumf>, %136, %cst_46 [1] : vector<9x9xf32> to vector<9xf32>
    %138 = vector.shape_cast %137 : vector<9xf32> to vector<9x1xf32>
    %139 = vector.broadcast %138 : vector<9x1xf32> to vector<9x9xf32>
    %140 = arith.subf %136, %139 : vector<9x9xf32>
    %141 = math.exp %140 : vector<9x9xf32>
    %cst_47 = arith.constant dense<0.000000e+00> : vector<9xf32>
    %142 = vector.multi_reduction <add>, %141, %cst_47 [1] : vector<9x9xf32> to vector<9xf32>
    %143 = vector.shape_cast %142 : vector<9xf32> to vector<9x1xf32>
    %144 = tpu.reciprocal %143 {approx = true} : vector<9x1xf32> -> vector<9x1xf32>
    %145 = vector.broadcast %144 : vector<9x1xf32> to vector<9x9xf32>
    %146 = arith.mulf %141, %145 : vector<9x9xf32>
    %147 = arith.truncf %146 : vector<9x9xf32> to vector<9x9xbf16>
    %cst_48 = arith.constant dense<0.000000e+00> : vector<9x8xf32>
    %148 = tpu.matmul %147, %133, %cst_48 {dimension_numbers = #tpu.dot_dimension_numbers<[1], [0], [0], [1], [0, 0, 1, 1], [], []>} : vector<9x9xbf16>, vector<9x8xbf16>, vector<9x8xf32> -> vector<9x8xf32>
    %c9 = arith.constant 9 : index
    %c0_49 = arith.constant 0 : index
    %149 = vector.load %arg27[%c9, %c0_49] : memref<18x32xf32, #tpu.memory_space<vmem>>, vector<9x8xf32>
    tpu.vector_store %arg27[%c9, %c0_49], %148 {strides = array<i32>} : memref<18x32xf32, #tpu.memory_space<vmem>>, vector<9x8xf32>,
    %150 = vector.extract_strided_slice %127 {offsets = [0, 8], sizes = [9, 8], strides = [1, 1]} : vector<9x96xf32> to vector<9x8xf32>
    %151 = arith.truncf %150 : vector<9x8xf32> to vector<9x8xbf16>
    %152 = vector.extract_strided_slice %127 {offsets = [0, 40], sizes = [9, 8], strides = [1, 1]} : vector<9x96xf32> to vector<9x8xf32>
    %153 = arith.truncf %152 : vector<9x8xf32> to vector<9x8xbf16>
    %154 = vector.extract_strided_slice %127 {offsets = [0, 72], sizes = [9, 8], strides = [1, 1]} : vector<9x96xf32> to vector<9x8xf32>
    %155 = arith.truncf %154 : vector<9x8xf32> to vector<9x8xbf16>
    %cst_50 = arith.constant dense<0.000000e+00> : vector<9x9xf32>
    %156 = tpu.matmul %151, %153, %cst_50 {dimension_numbers = #tpu.dot_dimension_numbers<[1], [1], [0], [0], [0, 0, 1, 0], [], []>} : vector<9x8xbf16>, vector<9x8xbf16>, vector<9x9xf32> -> vector<9x9xf32>
    %cst_51 = arith.constant 0.353553385 : f32
    %157 = vector.broadcast %cst_51 : f32 to vector<9x9xf32>
    %158 = arith.mulf %156, %157 : vector<9x9xf32>
    %cst_52 = arith.constant dense<0xFF800000> : vector<9xf32>
    %159 = vector.multi_reduction <maximumf>, %158, %cst_52 [1] : vector<9x9xf32> to vector<9xf32>
    %160 = vector.shape_cast %159 : vector<9xf32> to vector<9x1xf32>
    %161 = vector.broadcast %160 : vector<9x1xf32> to vector<9x9xf32>
    %162 = arith.subf %158, %161 : vector<9x9xf32>
    %163 = math.exp %162 : vector<9x9xf32>
    %cst_53 = arith.constant dense<0.000000e+00> : vector<9xf32>
    %164 = vector.multi_reduction <add>, %163, %cst_53 [1] : vector<9x9xf32> to vector<9xf32>
    %165 = vector.shape_cast %164 : vector<9xf32> to vector<9x1xf32>
    %166 = tpu.reciprocal %165 {approx = true} : vector<9x1xf32> -> vector<9x1xf32>
    %167 = vector.broadcast %166 : vector<9x1xf32> to vector<9x9xf32>
    %168 = arith.mulf %163, %167 : vector<9x9xf32>
    %169 = arith.truncf %168 : vector<9x9xf32> to vector<9x9xbf16>
    %cst_54 = arith.constant dense<0.000000e+00> : vector<9x8xf32>
    %170 = tpu.matmul %169, %155, %cst_54 {dimension_numbers = #tpu.dot_dimension_numbers<[1], [0], [0], [1], [0, 0, 1, 1], [], []>} : vector<9x9xbf16>, vector<9x8xbf16>, vector<9x8xf32> -> vector<9x8xf32>
    %c9_55 = arith.constant 9 : index
    %c8_56 = arith.constant 8 : index
    %171 = vector.load %arg27[%c9_55, %c8_56] : memref<18x32xf32, #tpu.memory_space<vmem>>, vector<9x8xf32>
    tpu.vector_store %arg27[%c9_55, %c8_56], %170 {strides = array<i32>} : memref<18x32xf32, #tpu.memory_space<vmem>>, vector<9x8xf32>,
    %172 = vector.extract_strided_slice %127 {offsets = [0, 16], sizes = [9, 8], strides = [1, 1]} : vector<9x96xf32> to vector<9x8xf32>
    %173 = arith.truncf %172 : vector<9x8xf32> to vector<9x8xbf16>
    %174 = vector.extract_strided_slice %127 {offsets = [0, 48], sizes = [9, 8], strides = [1, 1]} : vector<9x96xf32> to vector<9x8xf32>
    %175 = arith.truncf %174 : vector<9x8xf32> to vector<9x8xbf16>
    %176 = vector.extract_strided_slice %127 {offsets = [0, 80], sizes = [9, 8], strides = [1, 1]} : vector<9x96xf32> to vector<9x8xf32>
    %177 = arith.truncf %176 : vector<9x8xf32> to vector<9x8xbf16>
    %cst_57 = arith.constant dense<0.000000e+00> : vector<9x9xf32>
    %178 = tpu.matmul %173, %175, %cst_57 {dimension_numbers = #tpu.dot_dimension_numbers<[1], [1], [0], [0], [0, 0, 1, 0], [], []>} : vector<9x8xbf16>, vector<9x8xbf16>, vector<9x9xf32> -> vector<9x9xf32>
    %cst_58 = arith.constant 0.353553385 : f32
    %179 = vector.broadcast %cst_58 : f32 to vector<9x9xf32>
    %180 = arith.mulf %178, %179 : vector<9x9xf32>
    %cst_59 = arith.constant dense<0xFF800000> : vector<9xf32>
    %181 = vector.multi_reduction <maximumf>, %180, %cst_59 [1] : vector<9x9xf32> to vector<9xf32>
    %182 = vector.shape_cast %181 : vector<9xf32> to vector<9x1xf32>
    %183 = vector.broadcast %182 : vector<9x1xf32> to vector<9x9xf32>
    %184 = arith.subf %180, %183 : vector<9x9xf32>
    %185 = math.exp %184 : vector<9x9xf32>
    %cst_60 = arith.constant dense<0.000000e+00> : vector<9xf32>
    %186 = vector.multi_reduction <add>, %185, %cst_60 [1] : vector<9x9xf32> to vector<9xf32>
    %187 = vector.shape_cast %186 : vector<9xf32> to vector<9x1xf32>
    %188 = tpu.reciprocal %187 {approx = true} : vector<9x1xf32> -> vector<9x1xf32>
    %189 = vector.broadcast %188 : vector<9x1xf32> to vector<9x9xf32>
    %190 = arith.mulf %185, %189 : vector<9x9xf32>
    %191 = arith.truncf %190 : vector<9x9xf32> to vector<9x9xbf16>
    %cst_61 = arith.constant dense<0.000000e+00> : vector<9x8xf32>
    %192 = tpu.matmul %191, %177, %cst_61 {dimension_numbers = #tpu.dot_dimension_numbers<[1], [0], [0], [1], [0, 0, 1, 1], [], []>} : vector<9x9xbf16>, vector<9x8xbf16>, vector<9x8xf32> -> vector<9x8xf32>
    %c9_62 = arith.constant 9 : index
    %c16_63 = arith.constant 16 : index
    %193 = vector.load %arg27[%c9_62, %c16_63] : memref<18x32xf32, #tpu.memory_space<vmem>>, vector<9x8xf32>
    tpu.vector_store %arg27[%c9_62, %c16_63], %192 {strides = array<i32>} : memref<18x32xf32, #tpu.memory_space<vmem>>, vector<9x8xf32>,
    %194 = vector.extract_strided_slice %127 {offsets = [0, 24], sizes = [9, 8], strides = [1, 1]} : vector<9x96xf32> to vector<9x8xf32>
    %195 = arith.truncf %194 : vector<9x8xf32> to vector<9x8xbf16>
    %196 = vector.extract_strided_slice %127 {offsets = [0, 56], sizes = [9, 8], strides = [1, 1]} : vector<9x96xf32> to vector<9x8xf32>
    %197 = arith.truncf %196 : vector<9x8xf32> to vector<9x8xbf16>
    %198 = vector.extract_strided_slice %127 {offsets = [0, 88], sizes = [9, 8], strides = [1, 1]} : vector<9x96xf32> to vector<9x8xf32>
    %199 = arith.truncf %198 : vector<9x8xf32> to vector<9x8xbf16>
    %cst_64 = arith.constant dense<0.000000e+00> : vector<9x9xf32>
    %200 = tpu.matmul %195, %197, %cst_64 {dimension_numbers = #tpu.dot_dimension_numbers<[1], [1], [0], [0], [0, 0, 1, 0], [], []>} : vector<9x8xbf16>, vector<9x8xbf16>, vector<9x9xf32> -> vector<9x9xf32>
    %cst_65 = arith.constant 0.353553385 : f32
    %201 = vector.broadcast %cst_65 : f32 to vector<9x9xf32>
    %202 = arith.mulf %200, %201 : vector<9x9xf32>
    %cst_66 = arith.constant dense<0xFF800000> : vector<9xf32>
    %203 = vector.multi_reduction <maximumf>, %202, %cst_66 [1] : vector<9x9xf32> to vector<9xf32>
    %204 = vector.shape_cast %203 : vector<9xf32> to vector<9x1xf32>
    %205 = vector.broadcast %204 : vector<9x1xf32> to vector<9x9xf32>
    %206 = arith.subf %202, %205 : vector<9x9xf32>
    %207 = math.exp %206 : vector<9x9xf32>
    %cst_67 = arith.constant dense<0.000000e+00> : vector<9xf32>
    %208 = vector.multi_reduction <add>, %207, %cst_67 [1] : vector<9x9xf32> to vector<9xf32>
    %209 = vector.shape_cast %208 : vector<9xf32> to vector<9x1xf32>
    %210 = tpu.reciprocal %209 {approx = true} : vector<9x1xf32> -> vector<9x1xf32>
    %211 = vector.broadcast %210 : vector<9x1xf32> to vector<9x9xf32>
    %212 = arith.mulf %207, %211 : vector<9x9xf32>
    %213 = arith.truncf %212 : vector<9x9xf32> to vector<9x9xbf16>
    %cst_68 = arith.constant dense<0.000000e+00> : vector<9x8xf32>
    %214 = tpu.matmul %213, %199, %cst_68 {dimension_numbers = #tpu.dot_dimension_numbers<[1], [0], [0], [1], [0, 0, 1, 1], [], []>} : vector<9x9xbf16>, vector<9x8xbf16>, vector<9x8xf32> -> vector<9x8xf32>
    %c9_69 = arith.constant 9 : index
    %c24_70 = arith.constant 24 : index
    %215 = vector.load %arg27[%c9_69, %c24_70] : memref<18x32xf32, #tpu.memory_space<vmem>>, vector<9x8xf32>
    tpu.vector_store %arg27[%c9_69, %c24_70], %214 {strides = array<i32>} : memref<18x32xf32, #tpu.memory_space<vmem>>, vector<9x8xf32>,
    %c0_71 = arith.constant 0 : index
    %c0_72 = arith.constant 0 : index
    %216 = vector.load %arg27[%c0_71, %c0_72] : memref<18x32xf32, #tpu.memory_space<vmem>>, vector<18x32xf32>
    %217 = arith.truncf %216 : vector<18x32xf32> to vector<18x32xbf16>
    %c0_73 = arith.constant 0 : index
    %c0_74 = arith.constant 0 : index
    %c0_75 = arith.constant 0 : index
    %218 = vector.load %arg10[%c0_73, %c0_74, %c0_75] : memref<1x32x32xbf16, #tpu.memory_space<vmem>>, vector<1x32x32xbf16>
    %219 = vector.shape_cast %218 : vector<1x32x32xbf16> to vector<32x32xbf16>
    %cst_76 = arith.constant dense<0.000000e+00> : vector<18x32xf32>
    %220 = tpu.matmul %217, %219, %cst_76 {dimension_numbers = #tpu.dot_dimension_numbers<[1], [0], [0], [1], [0, 0, 1, 1], [], []>} : vector<18x32xbf16>, vector<32x32xbf16>, vector<18x32xf32> -> vector<18x32xf32>
    %c0_77 = arith.constant 0 : index
    %c0_78 = arith.constant 0 : index
    %c0_79 = arith.constant 0 : index
    %221 = vector.load %arg11[%c0_77, %c0_78, %c0_79] : memref<1x1x32xf32, #tpu.memory_space<vmem>>, vector<1x1x32xf32>
    %222 = vector.shape_cast %221 : vector<1x1x32xf32> to vector<1x32xf32>
    %223 = vector.broadcast %222 : vector<1x32xf32> to vector<18x32xf32>
    %224 = arith.addf %220, %223 : vector<18x32xf32>
    %225 = arith.addf %3, %224 : vector<18x32xf32>
    %c0_80 = arith.constant 0 : index
    %c0_81 = arith.constant 0 : index
    %c0_82 = arith.constant 0 : index
    %226 = vector.load %arg12[%c0_80, %c0_81, %c0_82] : memref<1x1x32xf32, #tpu.memory_space<vmem>>, vector<1x1x32xf32>
    %227 = vector.shape_cast %226 : vector<1x1x32xf32> to vector<1x32xf32>
    %c0_83 = arith.constant 0 : index
    %c0_84 = arith.constant 0 : index
    %c0_85 = arith.constant 0 : index
    %228 = vector.load %arg13[%c0_83, %c0_84, %c0_85] : memref<1x1x32xf32, #tpu.memory_space<vmem>>, vector<1x1x32xf32>
    %229 = vector.shape_cast %228 : vector<1x1x32xf32> to vector<1x32xf32>
    %cst_86 = arith.constant dense<0.000000e+00> : vector<18xf32>
    %230 = vector.multi_reduction <add>, %225, %cst_86 [1] : vector<18x32xf32> to vector<18xf32>
    %231 = vector.shape_cast %230 : vector<18xf32> to vector<18x1xf32>
    %cst_87 = arith.constant 3.200000e+01 : f32
    %232 = vector.broadcast %cst_87 : f32 to vector<18x1xf32>
    %233 = arith.divf %231, %232 : vector<18x1xf32>
    %234 = vector.broadcast %233 : vector<18x1xf32> to vector<18x32xf32>
    %235 = arith.subf %225, %234 : vector<18x32xf32>
    %236 = arith.mulf %235, %235 : vector<18x32xf32>
    %cst_88 = arith.constant dense<0.000000e+00> : vector<18xf32>
    %237 = vector.multi_reduction <add>, %236, %cst_88 [1] : vector<18x32xf32> to vector<18xf32>
    %238 = vector.shape_cast %237 : vector<18xf32> to vector<18x1xf32>
    %cst_89 = arith.constant 3.200000e+01 : f32
    %239 = vector.broadcast %cst_89 : f32 to vector<18x1xf32>
    %240 = arith.divf %238, %239 : vector<18x1xf32>
    %241 = vector.broadcast %233 : vector<18x1xf32> to vector<18x32xf32>
    %242 = arith.subf %225, %241 : vector<18x32xf32>
    %cst_90 = arith.constant 9.99999997E-7 : f32
    %243 = vector.broadcast %cst_90 : f32 to vector<18x1xf32>
    %244 = arith.addf %240, %243 : vector<18x1xf32>
    %245 = math.rsqrt %244 : vector<18x1xf32>
    %246 = vector.broadcast %245 : vector<18x1xf32> to vector<18x32xf32>
    %247 = arith.mulf %242, %246 : vector<18x32xf32>
    %248 = vector.broadcast %227 : vector<1x32xf32> to vector<18x32xf32>
    %249 = arith.mulf %247, %248 : vector<18x32xf32>
    %250 = vector.broadcast %229 : vector<1x32xf32> to vector<18x32xf32>
    %251 = arith.addf %249, %250 : vector<18x32xf32>
    %252 = arith.truncf %251 : vector<18x32xf32> to vector<18x32xbf16>
    %c0_91 = arith.constant 0 : index
    %c0_92 = arith.constant 0 : index
    %c0_93 = arith.constant 0 : index
    %253 = vector.load %arg14[%c0_91, %c0_92, %c0_93] : memref<1x32x128xbf16, #tpu.memory_space<vmem>>, vector<1x32x128xbf16>
    %254 = vector.shape_cast %253 : vector<1x32x128xbf16> to vector<32x128xbf16>
    %cst_94 = arith.constant dense<0.000000e+00> : vector<18x128xf32>
    %255 = tpu.matmul %252, %254, %cst_94 {dimension_numbers = #tpu.dot_dimension_numbers<[1], [0], [0], [1], [0, 0, 1, 1], [], []>} : vector<18x32xbf16>, vector<32x128xbf16>, vector<18x128xf32> -> vector<18x128xf32>
    %c0_95 = arith.constant 0 : index
    %c0_96 = arith.constant 0 : index
    %c0_97 = arith.constant 0 : index
    %256 = vector.load %arg15[%c0_95, %c0_96, %c0_97] : memref<1x1x128xf32, #tpu.memory_space<vmem>>, vector<1x1x128xf32>
    %257 = vector.shape_cast %256 : vector<1x1x128xf32> to vector<1x128xf32>
    %258 = vector.broadcast %257 : vector<1x128xf32> to vector<18x128xf32>
    %259 = arith.addf %255, %258 : vector<18x128xf32>
    %cst_98 = arith.constant 5.000000e-01 : f32
    %260 = vector.broadcast %cst_98 : f32 to vector<18x128xf32>
    %261 = arith.mulf %260, %259 : vector<18x128xf32>
    %cst_99 = arith.constant 0.707106769 : f32
    %262 = vector.broadcast %cst_99 : f32 to vector<18x128xf32>
    %263 = arith.mulf %259, %262 : vector<18x128xf32>
    %cst_100 = arith.constant 0.000000e+00 : f32
    %264 = vector.broadcast %cst_100 : f32 to vector<18x128xf32>
    %265 = arith.cmpf oge, %263, %264 : vector<18x128xf32>
    %cst_101 = arith.constant 1.000000e+00 : f32
    %cst_102 = arith.constant -1.000000e+00 : f32
    %266 = vector.broadcast %cst_101 : f32 to vector<18x128xf32>
    %267 = vector.broadcast %cst_102 : f32 to vector<18x128xf32>
    %268 = arith.select %265, %266, %267 : vector<18x128xi1>, vector<18x128xf32>
    %269 = math.absf %263 : vector<18x128xf32>
    %cst_103 = arith.constant 0.327591091 : f32
    %270 = vector.broadcast %cst_103 : f32 to vector<18x128xf32>
    %271 = arith.mulf %270, %269 : vector<18x128xf32>
    %cst_104 = arith.constant 1.000000e+00 : f32
    %272 = vector.broadcast %cst_104 : f32 to vector<18x128xf32>
    %273 = arith.addf %272, %271 : vector<18x128xf32>
    %cst_105 = arith.constant 1.000000e+00 : f32
    %274 = vector.broadcast %cst_105 : f32 to vector<18x128xf32>
    %275 = arith.divf %274, %273 : vector<18x128xf32>
    %cst_106 = arith.constant 1.06140542 : f32
    %276 = vector.broadcast %cst_106 : f32 to vector<18x128xf32>
    %277 = arith.mulf %276, %275 : vector<18x128xf32>
    %cst_107 = arith.constant -1.45315206 : f32
    %278 = vector.broadcast %cst_107 : f32 to vector<18x128xf32>
    %279 = arith.addf %277, %278 : vector<18x128xf32>
    %280 = arith.mulf %279, %275 : vector<18x128xf32>
    %cst_108 = arith.constant 1.42141378 : f32
    %281 = vector.broadcast %cst_108 : f32 to vector<18x128xf32>
    %282 = arith.addf %280, %281 : vector<18x128xf32>
    %283 = arith.mulf %282, %275 : vector<18x128xf32>
    %cst_109 = arith.constant -0.284496725 : f32
    %284 = vector.broadcast %cst_109 : f32 to vector<18x128xf32>
    %285 = arith.addf %283, %284 : vector<18x128xf32>
    %286 = arith.mulf %285, %275 : vector<18x128xf32>
    %cst_110 = arith.constant 0.254829586 : f32
    %287 = vector.broadcast %cst_110 : f32 to vector<18x128xf32>
    %288 = arith.addf %286, %287 : vector<18x128xf32>
    %289 = arith.mulf %288, %275 : vector<18x128xf32>
    %cst_111 = arith.constant 0.000000e+00 : f32
    %290 = vector.broadcast %cst_111 : f32 to vector<18x128xf32>
    %291 = arith.subf %290, %269 : vector<18x128xf32>
    %292 = arith.mulf %291, %269 : vector<18x128xf32>
    %293 = math.exp %292 : vector<18x128xf32>
    %294 = arith.mulf %289, %293 : vector<18x128xf32>
    %cst_112 = arith.constant 1.000000e+00 : f32
    %295 = vector.broadcast %cst_112 : f32 to vector<18x128xf32>
    %296 = arith.subf %295, %294 : vector<18x128xf32>
    %297 = arith.mulf %268, %296 : vector<18x128xf32>
    %cst_113 = arith.constant 1.000000e+00 : f32
    %298 = vector.broadcast %cst_113 : f32 to vector<18x128xf32>
    %299 = arith.addf %298, %297 : vector<18x128xf32>
    %300 = arith.mulf %261, %299 : vector<18x128xf32>
    %301 = arith.truncf %300 : vector<18x128xf32> to vector<18x128xbf16>
    %c0_114 = arith.constant 0 : index
    %c0_115 = arith.constant 0 : index
    %c0_116 = arith.constant 0 : index
    %302 = vector.load %arg16[%c0_114, %c0_115, %c0_116] : memref<1x128x32xbf16, #tpu.memory_space<vmem>>, vector<1x128x32xbf16>
    %303 = vector.shape_cast %302 : vector<1x128x32xbf16> to vector<128x32xbf16>
    %cst_117 = arith.constant dense<0.000000e+00> : vector<18x32xf32>
    %304 = tpu.matmul %301, %303, %cst_117 {dimension_numbers = #tpu.dot_dimension_numbers<[1], [0], [0], [1], [0, 0, 1, 1], [], []>} : vector<18x128xbf16>, vector<128x32xbf16>, vector<18x32xf32> -> vector<18x32xf32>
    %c0_118 = arith.constant 0 : index
    %c0_119 = arith.constant 0 : index
    %c0_120 = arith.constant 0 : index
    %305 = vector.load %arg17[%c0_118, %c0_119, %c0_120] : memref<1x1x32xf32, #tpu.memory_space<vmem>>, vector<1x1x32xf32>
    %306 = vector.shape_cast %305 : vector<1x1x32xf32> to vector<1x32xf32>
    %307 = vector.broadcast %306 : vector<1x32xf32> to vector<18x32xf32>
    %308 = arith.addf %304, %307 : vector<18x32xf32>
    %309 = arith.addf %225, %308 : vector<18x32xf32>
    %c0_121 = arith.constant 0 : index
    %c0_122 = arith.constant 0 : index
    %310 = vector.load %arg26[%c0_121, %c0_122] : memref<18x32xf32, #tpu.memory_space<vmem>>, vector<18x32xf32>
    tpu.vector_store %arg26[%c0_121, %c0_122], %309 {strides = array<i32>} : memref<18x32xf32, #tpu.memory_space<vmem>>, vector<18x32xf32>,
    %c1_i32 = arith.constant 1 : i32
    %311 = arith.cmpi eq, %arg0, %c1_i32 : i32
    %312 = arith.extui %311 : i1 to i32
    %c0_i32_123 = arith.constant 0 : i32
    %313 = arith.cmpi ne, %312, %c0_i32_123 : i32
    scf.if %313 {
      %314 = vector.extract_strided_slice %309 {offsets = [0, 0], sizes = [8, 32], strides = [1, 1]} : vector<18x32xf32> to vector<8x32xf32>
      %cst_124 = arith.constant dense<0.000000e+00> : vector<32xf32>
      %315 = vector.multi_reduction <add>, %314, %cst_124 [0] : vector<8x32xf32> to vector<32xf32>
      %316 = vector.shape_cast %315 : vector<32xf32> to vector<1x32xf32>
      %cst_125 = arith.constant 1.250000e-01 : f32
      %317 = vector.broadcast %cst_125 : f32 to vector<1x32xf32>
      %318 = arith.mulf %316, %317 : vector<1x32xf32>
      %c0_126 = arith.constant 0 : index
      %c0_127 = arith.constant 0 : index
      %319 = vector.load %arg28[%c0_126, %c0_127] : memref<2x32xf32, #tpu.memory_space<vmem>>, vector<1x32xf32>
      tpu.vector_store %arg28[%c0_126, %c0_127], %318 {strides = array<i32>} : memref<2x32xf32, #tpu.memory_space<vmem>>, vector<1x32xf32>,
      %320 = vector.extract_strided_slice %309 {offsets = [9, 0], sizes = [8, 32], strides = [1, 1]} : vector<18x32xf32> to vector<8x32xf32>
      %cst_128 = arith.constant dense<0.000000e+00> : vector<32xf32>
      %321 = vector.multi_reduction <add>, %320, %cst_128 [0] : vector<8x32xf32> to vector<32xf32>
      %322 = vector.shape_cast %321 : vector<32xf32> to vector<1x32xf32>
      %cst_129 = arith.constant 1.250000e-01 : f32
      %323 = vector.broadcast %cst_129 : f32 to vector<1x32xf32>
      %324 = arith.mulf %322, %323 : vector<1x32xf32>
      %c1 = arith.constant 1 : index
      %c0_130 = arith.constant 0 : index
      %325 = vector.load %arg28[%c1, %c0_130] : memref<2x32xf32, #tpu.memory_space<vmem>>, vector<1x32xf32>
      tpu.vector_store %arg28[%c1, %c0_130], %324 {strides = array<i32>} : memref<2x32xf32, #tpu.memory_space<vmem>>, vector<1x32xf32>,
      %c0_131 = arith.constant 0 : index
      %c0_132 = arith.constant 0 : index
      %326 = vector.load %arg28[%c0_131, %c0_132] : memref<2x32xf32, #tpu.memory_space<vmem>>, vector<2x32xf32>
      %c0_133 = arith.constant 0 : index
      %c0_134 = arith.constant 0 : index
      %327 = vector.load %arg18[%c0_133, %c0_134] : memref<1x32xf32, #tpu.memory_space<vmem>>, vector<1x32xf32>
      %c0_135 = arith.constant 0 : index
      %c0_136 = arith.constant 0 : index
      %328 = vector.load %arg19[%c0_135, %c0_136] : memref<1x32xf32, #tpu.memory_space<vmem>>, vector<1x32xf32>
      %cst_137 = arith.constant dense<0.000000e+00> : vector<2xf32>
      %329 = vector.multi_reduction <add>, %326, %cst_137 [1] : vector<2x32xf32> to vector<2xf32>
      %330 = vector.shape_cast %329 : vector<2xf32> to vector<2x1xf32>
      %cst_138 = arith.constant 3.200000e+01 : f32
      %331 = vector.broadcast %cst_138 : f32 to vector<2x1xf32>
      %332 = arith.divf %330, %331 : vector<2x1xf32>
      %333 = vector.broadcast %332 : vector<2x1xf32> to vector<2x32xf32>
      %334 = arith.subf %326, %333 : vector<2x32xf32>
      %335 = arith.mulf %334, %334 : vector<2x32xf32>
      %cst_139 = arith.constant dense<0.000000e+00> : vector<2xf32>
      %336 = vector.multi_reduction <add>, %335, %cst_139 [1] : vector<2x32xf32> to vector<2xf32>
      %337 = vector.shape_cast %336 : vector<2xf32> to vector<2x1xf32>
      %cst_140 = arith.constant 3.200000e+01 : f32
      %338 = vector.broadcast %cst_140 : f32 to vector<2x1xf32>
      %339 = arith.divf %337, %338 : vector<2x1xf32>
      %340 = vector.broadcast %332 : vector<2x1xf32> to vector<2x32xf32>
      %341 = arith.subf %326, %340 : vector<2x32xf32>
      %cst_141 = arith.constant 9.99999997E-7 : f32
      %342 = vector.broadcast %cst_141 : f32 to vector<2x1xf32>
      %343 = arith.addf %339, %342 : vector<2x1xf32>
      %344 = math.rsqrt %343 : vector<2x1xf32>
      %345 = vector.broadcast %344 : vector<2x1xf32> to vector<2x32xf32>
      %346 = arith.mulf %341, %345 : vector<2x32xf32>
      %347 = vector.broadcast %327 : vector<1x32xf32> to vector<2x32xf32>
      %348 = arith.mulf %346, %347 : vector<2x32xf32>
      %349 = vector.broadcast %328 : vector<1x32xf32> to vector<2x32xf32>
      %350 = arith.addf %348, %349 : vector<2x32xf32>
      %351 = arith.truncf %350 : vector<2x32xf32> to vector<2x32xbf16>
      %c0_142 = arith.constant 0 : index
      %c0_143 = arith.constant 0 : index
      %352 = vector.load %arg20[%c0_142, %c0_143] : memref<32x32xbf16, #tpu.memory_space<vmem>>, vector<32x32xbf16>
      %cst_144 = arith.constant dense<0.000000e+00> : vector<2x32xf32>
      %353 = tpu.matmul %351, %352, %cst_144 {dimension_numbers = #tpu.dot_dimension_numbers<[1], [0], [0], [1], [0, 0, 1, 1], [], []>} : vector<2x32xbf16>, vector<32x32xbf16>, vector<2x32xf32> -> vector<2x32xf32>
      %c0_145 = arith.constant 0 : index
      %c0_146 = arith.constant 0 : index
      %354 = vector.load %arg21[%c0_145, %c0_146] : memref<1x32xf32, #tpu.memory_space<vmem>>, vector<1x32xf32>
      %355 = vector.broadcast %354 : vector<1x32xf32> to vector<2x32xf32>
      %356 = arith.addf %353, %355 : vector<2x32xf32>
      %c0_147 = arith.constant 0 : index
      %c0_148 = arith.constant 0 : index
      %357 = vector.load %arg24[%c0_147, %c0_148] : memref<2x32xf32, #tpu.memory_space<vmem>>, vector<2x32xf32>
      tpu.vector_store %arg24[%c0_147, %c0_148], %356 {strides = array<i32>} : memref<2x32xf32, #tpu.memory_space<vmem>>, vector<2x32xf32>,
      %358 = arith.truncf %356 : vector<2x32xf32> to vector<2x32xbf16>
      %c0_149 = arith.constant 0 : index
      %c0_150 = arith.constant 0 : index
      %359 = vector.load %arg22[%c0_149, %c0_150] : memref<32x32xbf16, #tpu.memory_space<vmem>>, vector<32x32xbf16>
      %cst_151 = arith.constant dense<0.000000e+00> : vector<2x32xf32>
      %360 = tpu.matmul %358, %359, %cst_151 {dimension_numbers = #tpu.dot_dimension_numbers<[1], [0], [0], [1], [0, 0, 1, 1], [], []>} : vector<2x32xbf16>, vector<32x32xbf16>, vector<2x32xf32> -> vector<2x32xf32>
      %c0_152 = arith.constant 0 : index
      %c0_153 = arith.constant 0 : index
      %361 = vector.load %arg23[%c0_152, %c0_153] : memref<1x32xf32, #tpu.memory_space<vmem>>, vector<1x32xf32>
      %362 = vector.broadcast %361 : vector<1x32xf32> to vector<2x32xf32>
      %363 = arith.addf %360, %362 : vector<2x32xf32>
      %c0_154 = arith.constant 0 : index
      %c0_155 = arith.constant 0 : index
      %364 = vector.load %arg25[%c0_154, %c0_155] : memref<2x32xf32, #tpu.memory_space<vmem>>, vector<2x32xf32>
      tpu.vector_store %arg25[%c0_154, %c0_155], %363 {strides = array<i32>} : memref<2x32xf32, #tpu.memory_space<vmem>>, vector<2x32xf32>,
    } else {
    }
    return
  }
  func.func @transform_0(%arg0: i32) -> (i32, i32, i32) {
    %c0_i32 = arith.constant 0 : i32
    %c0_i32_0 = arith.constant 0 : i32
    %c0_i32_1 = arith.constant 0 : i32
    %c0_i32_2 = arith.constant 0 : i32
    return %c0_i32, %c0_i32_0, %c0_i32_1 : i32, i32, i32
  }
  func.func @transform_1(%arg0: i32) -> (i32, i32) {
    %c0_i32 = arith.constant 0 : i32
    %c0_i32_0 = arith.constant 0 : i32
    %c0_i32_1 = arith.constant 0 : i32
    return %c0_i32, %c0_i32_0 : i32, i32
  }
  func.func @transform_2(%arg0: i32) -> (i32, i32) {
    %c0_i32 = arith.constant 0 : i32
    %c0_i32_0 = arith.constant 0 : i32
    %c0_i32_1 = arith.constant 0 : i32
    return %c0_i32, %c0_i32_0 : i32, i32
  }
  func.func @transform_3(%arg0: i32) -> (i32, i32) {
    %c0_i32 = arith.constant 0 : i32
    %c0_i32_0 = arith.constant 0 : i32
    %c0_i32_1 = arith.constant 0 : i32
    return %c0_i32, %c0_i32_0 : i32, i32
  }
  func.func @transform_4(%arg0: i32) -> (i32, i32) {
    %c0_i32 = arith.constant 0 : i32
    %c0_i32_0 = arith.constant 0 : i32
    %c0_i32_1 = arith.constant 0 : i32
    return %c0_i32, %c0_i32_0 : i32, i32
  }
  func.func @transform_5(%arg0: i32) -> (i32, i32, i32) {
    %c0_i32 = arith.constant 0 : i32
    %c0_i32_0 = arith.constant 0 : i32
    %c0_i32_1 = arith.constant 0 : i32
    return %arg0, %c0_i32, %c0_i32_0 : i32, i32, i32
  }
  func.func @transform_6(%arg0: i32) -> (i32, i32, i32) {
    %c0_i32 = arith.constant 0 : i32
    %c0_i32_0 = arith.constant 0 : i32
    %c0_i32_1 = arith.constant 0 : i32
    return %arg0, %c0_i32, %c0_i32_0 : i32, i32, i32
  }
  func.func @transform_7(%arg0: i32) -> (i32, i32, i32) {
    %c0_i32 = arith.constant 0 : i32
    %c0_i32_0 = arith.constant 0 : i32
    %c0_i32_1 = arith.constant 0 : i32
    return %arg0, %c0_i32, %c0_i32_0 : i32, i32, i32
  }
  func.func @transform_8(%arg0: i32) -> (i32, i32, i32) {
    %c0_i32 = arith.constant 0 : i32
    %c0_i32_0 = arith.constant 0 : i32
    %c0_i32_1 = arith.constant 0 : i32
    return %arg0, %c0_i32, %c0_i32_0 : i32, i32, i32
  }
  func.func @transform_9(%arg0: i32) -> (i32, i32, i32) {
    %c0_i32 = arith.constant 0 : i32
    %c0_i32_0 = arith.constant 0 : i32
    %c0_i32_1 = arith.constant 0 : i32
    return %arg0, %c0_i32, %c0_i32_0 : i32, i32, i32
  }
  func.func @transform_10(%arg0: i32) -> (i32, i32, i32) {
    %c0_i32 = arith.constant 0 : i32
    %c0_i32_0 = arith.constant 0 : i32
    %c0_i32_1 = arith.constant 0 : i32
    return %arg0, %c0_i32, %c0_i32_0 : i32, i32, i32
  }
  func.func @transform_11(%arg0: i32) -> (i32, i32, i32) {
    %c0_i32 = arith.constant 0 : i32
    %c0_i32_0 = arith.constant 0 : i32
    %c0_i32_1 = arith.constant 0 : i32
    return %arg0, %c0_i32, %c0_i32_0 : i32, i32, i32
  }
  func.func @transform_12(%arg0: i32) -> (i32, i32, i32) {
    %c0_i32 = arith.constant 0 : i32
    %c0_i32_0 = arith.constant 0 : i32
    %c0_i32_1 = arith.constant 0 : i32
    return %arg0, %c0_i32, %c0_i32_0 : i32, i32, i32
  }
  func.func @transform_13(%arg0: i32) -> (i32, i32, i32) {
    %c0_i32 = arith.constant 0 : i32
    %c0_i32_0 = arith.constant 0 : i32
    %c0_i32_1 = arith.constant 0 : i32
    return %arg0, %c0_i32, %c0_i32_0 : i32, i32, i32
  }
  func.func @transform_14(%arg0: i32) -> (i32, i32, i32) {
    %c0_i32 = arith.constant 0 : i32
    %c0_i32_0 = arith.constant 0 : i32
    %c0_i32_1 = arith.constant 0 : i32
    return %arg0, %c0_i32, %c0_i32_0 : i32, i32, i32
  }
  func.func @transform_15(%arg0: i32) -> (i32, i32, i32) {
    %c0_i32 = arith.constant 0 : i32
    %c0_i32_0 = arith.constant 0 : i32
    %c0_i32_1 = arith.constant 0 : i32
    return %arg0, %c0_i32, %c0_i32_0 : i32, i32, i32
  }
  func.func @transform_16(%arg0: i32) -> (i32, i32, i32) {
    %c0_i32 = arith.constant 0 : i32
    %c0_i32_0 = arith.constant 0 : i32
    %c0_i32_1 = arith.constant 0 : i32
    return %arg0, %c0_i32, %c0_i32_0 : i32, i32, i32
  }
  func.func @transform_17(%arg0: i32) -> (i32, i32) {
    %c0_i32 = arith.constant 0 : i32
    %c0_i32_0 = arith.constant 0 : i32
    %c0_i32_1 = arith.constant 0 : i32
    return %c0_i32, %c0_i32_0 : i32, i32
  }
  func.func @transform_18(%arg0: i32) -> (i32, i32) {
    %c0_i32 = arith.constant 0 : i32
    %c0_i32_0 = arith.constant 0 : i32
    %c0_i32_1 = arith.constant 0 : i32
    return %c0_i32, %c0_i32_0 : i32, i32
  }
  func.func @transform_19(%arg0: i32) -> (i32, i32) {
    %c0_i32 = arith.constant 0 : i32
    %c0_i32_0 = arith.constant 0 : i32
    %c0_i32_1 = arith.constant 0 : i32
    return %c0_i32, %c0_i32_0 : i32, i32
  }
  func.func @transform_20(%arg0: i32) -> (i32, i32) {
    %c0_i32 = arith.constant 0 : i32
    %c0_i32_0 = arith.constant 0 : i32
    %c0_i32_1 = arith.constant 0 : i32
    return %c0_i32, %c0_i32_0 : i32, i32
  }
  func.func @transform_21(%arg0: i32) -> (i32, i32) {
    %c0_i32 = arith.constant 0 : i32
    %c0_i32_0 = arith.constant 0 : i32
    %c0_i32_1 = arith.constant 0 : i32
    return %c0_i32, %c0_i32_0 : i32, i32
  }
  func.func @transform_22(%arg0: i32) -> (i32, i32) {
    %c0_i32 = arith.constant 0 : i32
    %c0_i32_0 = arith.constant 0 : i32
    %c0_i32_1 = arith.constant 0 : i32
    return %c0_i32, %c0_i32_0 : i32, i32
  }
  func.func @transform_23(%arg0: i32) -> (i32, i32) {
    %c0_i32 = arith.constant 0 : i32
    %c0_i32_0 = arith.constant 0 : i32
    %c0_i32_1 = arith.constant 0 : i32
    return %c0_i32, %c0_i32_0 : i32, i32
  }
  func.func @transform_24(%arg0: i32) -> (i32, i32) {
    %c0_i32 = arith.constant 0 : i32
    %c0_i32_0 = arith.constant 0 : i32
    %c0_i32_1 = arith.constant 0 : i32
    return %c0_i32, %c0_i32_0 : i32, i32
  }
}

</mosaic_0001>

<bundles_post_ra>
// kernel: transformer_encoder_forward.1
= control target key start
LH: loop header
LB: loop body
LE: loop exit
PB: predicated region body
PF: predicated region fallthrough
CT: control target
= control target key end

     0   :  { %s3499_s0 = inlined_call_operand.vmem [shape: f32[2,8,4], index: 0, kind: input, shape index: {}]   ;;  %s3500_s1 = inlined_call_operand.vmem [shape: bf16[4,32], index: 1, kind: input, shape index: {}]   ;;  %s3501_s2 = inlined_call_operand.vmem [shape: f32[1,32], index: 2, kind: input, shape index: {}]   ;;  %s3502_s3 = inlined_call_operand.vmem [shape: f32[8,32], index: 3, kind: input, shape index: {}]   ;;  %s3503_s4 = inlined_call_operand.vmem [shape: f32[1,32], index: 4, kind: input, shape index: {}]   ;;  %s3504_s5 = inlined_call_operand.vmem [shape: f32[2,1,32], index: 5, kind: input, shape index: {}]   ;;  %s3505_s6 = inlined_call_operand.vmem [shape: f32[2,1,32], index: 6, kind: input, shape index: {}]   ;;  %s3506_s7 = inlined_call_operand.vmem [shape: bf16[2,32,96], index: 7, kind: input, shape index: {}]   ;;  %s3507_s8 = inlined_call_operand.vmem [shape: f32[2,1,96], index: 8, kind: input, shape index: {}]   ;;  %s3508_s9 = inlined_call_operand.vmem [shape: bf16[2,32,32], index: 9, kind: input, shape index: {}]   ;;  %s3509_s10 = inlined_call_operand.vmem [shape: f32[2,1,32], index: 10, kind: input, shape index: {}]   ;;  %s3510_s11 = inlined_call_operand.vmem [shape: f32[2,1,32], index: 11, kind: input, shape index: {}]   ;;  %s3511_s12 = inlined_call_operand.vmem [shape: f32[2,1,32], index: 12, kind: input, shape index: {}]   ;;  %s3512_s13 = inlined_call_operand.vmem [shape: bf16[2,32,128], index: 13, kind: input, shape index: {}]   ;;  %s3513_s14 = inlined_call_operand.vmem [shape: f32[2,1,128], index: 14, kind: input, shape index: {}]   ;;  %s3514_s15 = inlined_call_operand.vmem [shape: bf16[2,128,32], index: 15, kind: input, shape index: {}]   ;;  %s3515_s16 = inlined_call_operand.vmem [shape: f32[2,1,32], index: 16, kind: input, shape index: {}]   ;;  %s3516_s17 = inlined_call_operand.vmem [shape: f32[1,32], index: 17, kind: input, shape index: {}]   ;;  %s3517_s18 = inlined_call_operand.vmem [shape: f32[1,32], index: 18, kind: input, shape index: {}]   ;;  %s3518_s19 = inlined_call_operand.vmem [shape: bf16[32,32], index: 19, kind: input, shape index: {}]   ;;  %s3519_s20 = inlined_call_operand.vmem [shape: f32[1,32], index: 20, kind: input, shape index: {}]   ;;  %s3520_s21 = inlined_call_operand.vmem [shape: bf16[32,32], index: 21, kind: input, shape index: {}]   ;;  %s3521_s22 = inlined_call_operand.vmem [shape: f32[1,32], index: 22, kind: input, shape index: {}]   ;;  %s3522_s23 = inlined_call_operand.hbm [shape: f32[2,32], index: 23, kind: output, shape index: {0}]   ;;  %s3523_s24 = inlined_call_operand.hbm [shape: f32[2,32], index: 24, kind: output, shape index: {1}]  }
   0x1   :  { %3528 = sst [smem:[#allocation12_spill]] %s3499_s0 }
   0x2   :  { %3529 = sst [smem:[#allocation13_spill]] %s3500_s1 }
   0x3   :  { %3530 = sst [smem:[#allocation14_spill]] %s3501_s2 }
   0x4   :  { %3531 = sst [smem:[#allocation15_spill]] %s3502_s3 }
   0x5   :  { %3532 = sst [smem:[#allocation16_spill]] %s3503_s4 }
   0x6   :  { %3533 = sst [smem:[#allocation17_spill]] %s3504_s5 }
   0x7   :  { %3534 = sst [smem:[#allocation18_spill]] %s3505_s6 }
   0x8   :  { %3535 = sst [smem:[#allocation19_spill]] %s3506_s7 }
   0x9   :  { %3536 = sst [smem:[#allocation20_spill]] %s3507_s8 }
   0xa   :  { %3537 = sst [smem:[#allocation21_spill]] %s3508_s9 }
   0xb   :  { %3538 = sst [smem:[#allocation22_spill]] %s3517_s18 }
   0xc   :  { %3539 = sst [smem:[#allocation23_spill]] %s3519_s20 }
   0xd   :  { %3540 = sst [smem:[#allocation24_spill]] %s3521_s22 }
   0xe   :  { %3541 = sst [smem:[#allocation25_spill]] %s3522_s23 }
   0xf   :  { %3542 = sst [smem:[#allocation26_spill]] %s3523_s24 }
  0x10   :  { %30 = vsyncpa [#allocation6], 0 }
  0x11   :  { %31 = vsyncpa [#allocation8], 0  ;;  %s2969_s5 = smov 0  }
  0x12 LB: > { %3543 = sst [smem:[#allocation11_spill]] %s2823_s5  ;;  %s2975_s26 = sadd.s32 4294967295, %s2823_s5   ;;  %s2823_s5 = sphi %s2969_s5, %s37_s5  }
  0x13   : > { %p2467_p0 = scmp.ge.s32.totalorder %s2823_s5, 1  ;;  %p751_p1 = scmp.lt.s32.totalorder %s2823_s5, 3 }
  0x15   : > { %p752_p2 = pnand %p2467_p0, %p751_p1 }
  0x16   : > { %p851_p3 = scmp.lt.s32.totalorder (!%p752_p2), %s2975_s26, 1  ;;  %s3547_s24 = sld [smem:[#allocation19_spill]] (!%p752_p2) }
  0x17   : > { %755 = sbr.rel (%p752_p2) target bundleno = 3284 (0xcd4), region = 112  ;;  %s3548_s9 = sld [smem:[#allocation21_spill]] (!%p752_p2) }
  0x18   : > { %p2476_p4 = scmp.ne.s32.totalorder (!%p752_p2), %s2975_s26, 0 }
  0x1c   : > { %s2981_s27 = scalar_select %p851_p3, %s2975_s26, 1 }
  0x1d   : > { %s3549_s28 = sld [smem:[#allocation13_spill]] (!%p2476_p4) }
  0x1e   : > { %s2583_s25 = sshll.u32 %s2981_s27, 4  ;;  %s875_s3 = scalar_lea.vmem %s3510_s11, %s2981_s27 }
  0x1f   : > { %s2999_s23 = scalar_lea.vmem %s3547_s24, %s2583_s25  ;;  %s3004_s18 = scalar_lea.vmem %s3548_s9, %s2583_s25 }
  0x20   : > { %s878_s1 = scalar_lea.vmem %s3511_s12, %s2981_s27  ;;  %s3021_s6 = scalar_lea.vmem %s3512_s13, %s2583_s25 }
  0x21   : > { %s886_s5 = scalar_lea.vmem %s3513_s14, %s2981_s27  ;;  %s2586_s9 = sshll.u32 %s2981_s27, 6 }
  0x22   : > { %s3031_s0 = scalar_lea.vmem %s3514_s15, %s2586_s9  ;;  %899 = sbr.rel (%p2476_p4) target bundleno = 179 (0xb3), region = 116 }
  0x23   : > { %s3550_s22 = sld [smem:[#allocation16_spill]] (!%p2476_p4) }
  0x24   : > { %s3551_s2 = sld [smem:[#allocation12_spill]] (!%p2476_p4) }
  0x25   : > { %s3552_s20 = sld [smem:[#allocation14_spill]] (!%p2476_p4) }
  0x26   : > { %s3553_s8 = sld [smem:[#allocation15_spill]] (!%p2476_p4) }
  0x27   : > { %v900_v0 = vld [vmem:[%s3549_s28] sm:$0x3]  ;;  %vm911_vm0 = vcmask 1041408   ;;  %vm933_vm1 = vcmask 253952   ;;  %vm907_vm2 = vcmask 31744   ;;  %vm930_vm3 = vcmask 261120  }
  0x28   : > { %v913_v2 = vsel %vm911_vm0, %v900_v0, 0 }
  0x29   : > { %v932_v1 = vld [vmem:[%s3550_s22] sm:$0x1]  ;;  %922 = vmatpush.bf16.msra.mxu0 %v913_v2  ;;  %952 = vmatpush.bf16.msra.mxu1 %v913_v2 }
  0x2a   : > { %934 = vst.msk [vmem:[#allocation2 + $0x8] sm:$0x1] %vm933_vm1, %v932_v1  ;;  %v901_v3 = vld [vmem:[%s3551_s2] sm:$0xff]  ;;  %v2478_v4 = vld [vmem:[%s3551_s2 + $0x8] sm:$0xff] }
  0x2b   : > { %v902_v5 = vpack.c.bf16 %v901_v3, %v901_v3  ;;  %v937_v6 = vpack.c.bf16 %v2478_v4, %v2478_v4  ;;  %v961_v7 = vld [vmem:[%s3550_s22] sm:$0x1] }
  0x2c   : > { %962 = vst.msk [vmem:[#allocation2 + $0x11] sm:$0x1] %vm933_vm1, %v961_v7  ;;  %v2644_v8 = vld [vmem:[%s3552_s20] ss:$0 sm:$0xff] }
  0x2d   : > { %2477 = vmatmul.msk.bf16.vlgmr.msra.gmra.mxu0 %vm907_vm2, %v902_v5  ;;  %2479 = vmatmul.msk.bf16.vlgmr.msra.gmra.mxu1 %vm907_vm2, %v937_v6  ;;  %v2645_v9 = vld [vmem:[%s3552_s20] ss:$0 sm:$0xff] }
  0x2e   : > { %v928_v11 = vld [vmem:[%s3553_s8] sm:$0xff] }
  0xaa   : > { %v924_v10 = vpop.f32.mrf.mxu0  ;;  %v954_v12 = vpop.f32.mrf.mxu1 }
  0xab   : > { %v925_v13 = vadd.f32 %v2644_v8, %v924_v10  ;;  %v955_v14 = vadd.f32 %v2645_v9, %v954_v12 }
  0xad   : > { %v929_v15 = vadd.f32 %v928_v11, %v925_v13  ;;  %v959_v16 = vadd.f32 %v955_v14, %v928_v11 }
  0xaf   : > { %931 = vst.msk [vmem:[#allocation2] sm:$0xff] %vm930_vm3, %v929_v15 }
  0xb0   : > { %960 = vst.msk [vmem:[#allocation2 + $0x9] sm:$0xff] %vm930_vm3, %v959_v16 }
  0xb2   : > { %v926_v17 = vpop.f32.mrf.mxu0  ;;  %v956_v18 = vpop.f32.mrf.mxu1 }
  0xb3 PF: > { %vm968_vm4 = vcmask 261120   ;;  %vm975_vm5 = vcmask 254976   ;;  %v2825_v25 = vmov 32.0   ;;  %v2588_v47 = vld [vmem:[%s2999_s23 + $0x8] sm:$0xff]  ;;  %v2587_v50 = vld [vmem:[%s2999_s23] sm:$0xff]  ;;  %s3554_s4 = sld [smem:[#allocation17_spill]] }
  0xb4   : > { %2654 = vrcp.f32 %v2825_v25  ;;  %1089 = vmatpush.bf16.msra.mxu0 %v2588_v47  ;;  %s3556_s9 = sld [smem:[#allocation18_spill]]  ;;  %s2828_s28 = smov 96   ;;  %vm1105_vm0 = vcmask 64512   ;;  %vm1158_vm1 = vcmask 1043456   ;;  %vm1159_vm2 = vcmask 1044480  }
  0xb5   : > { %s3558_s23 = sld [smem:[#allocation20_spill]]  ;;  %s2829_s24 = smov 120   ;;  %vm1128_vm3 = vcmask 72704  }
  0xb6   : > { %v963_v19 = vld [vmem:[#allocation2] sm:$0xff]  ;;  %s2833_s7 = smov 72   ;;  %s2834_s30 = smov 112  }
  0xb7   : > { %v969_v20 = vsel %vm968_vm4, %v963_v19, 0.0  ;;  %v964_v21 = vld [vmem:[#allocation2 + $0x8] sm:$0xff]  ;;  %v965_v23 = vld [vmem:[#allocation2 + $0x10] sm:$0x3]  ;;  %p2558_p5 = scmp.ne.s32.totalorder %s2975_s26, 1 }
  0xb8   : > { %970 = vadd.xlane.f32.xlu0 %v969_v20  ;;  %v972_v22 = vsel %vm968_vm4, %v964_v21, 0.0  ;;  %v976_v24 = vsel %vm975_vm5, %v965_v23, 0.0  ;;  %1090 = vmatpush.bf16.msra.mxu0 %v2587_v50 }
  0xb9   : > { %s3555_s25 = scalar_lea.vmem %s3554_s4, %s2981_s27  ;;  %s2826_s4 = smov 56  }
  0xba   : > { %v2655_v26 = vpop.eup %2654  ;;  %v2646_v8 = vld [vmem:[%s3555_s25] ss:$0 sm:$0xff]  ;;  %s3557_s29 = scalar_lea.vmem %s3556_s9, %s2981_s27  ;;  %s2827_s25 = smov 88  }
  0xbb   : > { %v980_v27 = vmul.f32 32.0, %v2655_v26  ;;  %vm984_vm6 = vweird.f32 %v2655_v26  ;;  %v2647_v15 = vld [vmem:[%s3557_s29] ss:$0 sm:$0xff]  ;;  %s3559_s8 = scalar_lea.vmem %s3558_s23, %s2981_s27  ;;  %s2830_s9 = smov 80  }
  0xbc   : > { %s2831_s29 = smov 104   ;;  %s2835_s23 = smov 40  }
  0xbd   : > { %v981_v28 = vsub.f32 1.0, %v980_v27 }
  0xbf   : > { %v982_v29 = vmul.f32 %v2655_v26, %v981_v28 }
  0xc0   : > { %973 = vadd.xlane.f32.xlu0 %v972_v22 }
  0xc1   : > { %v983_v30 = vadd.f32 %v2655_v26, %v982_v29  ;;  %v2648_v29 = vld [vmem:[%s3559_s8] ss:$0 sm:$0xff]  ;;  %s2836_s8 = smov 64  }
  0xc3   : > { %v3065_v31 = vsel %vm984_vm6, %v2655_v26, %v983_v30  ;;  %vm1132_vm6 = vcmask 65536  }
  0xc8   : > { %977 = vadd.xlane.f32.xlu0 %v976_v24 }
 0x12b   : > { %v971_v32 = vpop.xlane.xlu0 %970 }
 0x12c   : > { %v986_v33 = vmul.f32 %v3065_v31, %v971_v32 }
 0x12e   : > { %v989_v34 = vsub.f32 %v963_v19, %v986_v33 }
 0x130   : > { %v992_v35 = vmul.f32 %v989_v34, %v989_v34 }
 0x132   : > { %v995_v36 = vsel %vm968_vm4, %v992_v35, 0.0 }
 0x133   : > { %996 = vadd.xlane.f32.xlu1 %v995_v36  ;;  %v974_v37 = vpop.xlane.xlu0 %973 }
 0x134   : > { %v987_v38 = vmul.f32 %v3065_v31, %v974_v37 }
 0x136   : > { %v990_v39 = vsub.f32 %v964_v21, %v987_v38 }
 0x138   : > { %v993_v40 = vmul.f32 %v990_v39, %v990_v39 }
 0x13a   : > { %v998_v41 = vsel %vm968_vm4, %v993_v40, 0.0 }
 0x13b   : > { %999 = vadd.xlane.f32.xlu1 %v998_v41  ;;  %v978_v42 = vpop.xlane.xlu0 %977 }
 0x13c   : > { %v988_v43 = vmul.f32 %v3065_v31, %v978_v42  ;;  %v2832_v42 = vmov 65535  }
 0x13e   : > { %v991_v44 = vsub.f32 %v965_v23, %v988_v43  ;;  %v1160_v43 = vsel %vm1158_vm1, 4294967295, %v2832_v42 }
 0x140   : > { %v994_v45 = vmul.f32 %v991_v44, %v991_v44 }
 0x142   : > { %v1001_v46 = vsel %vm975_vm5, %v994_v45, 0.0 }
 0x143   : > { %1002 = vadd.xlane.f32.xlu1 %v1001_v46 }
 0x1a6   : > { %v997_v48 = vpop.xlane.xlu1 %996 }
 0x1a7   : > { %v1004_v49 = vmul.f32 %v997_v48, %v3065_v31 }
 0x1a9   : > { %v1007_v51 = vadd.f32 1e-06, %v1004_v49 }
 0x1ab   : > { %2656 = vrsqrt.f32 %v1007_v51  ;;  %vm1016_vm8 = vweird.f32 %v1007_v51 }
 0x1ae   : > { %v1000_v52 = vpop.xlane.xlu1 %999 }
 0x1af   : > { %v1005_v53 = vmul.f32 %v1000_v52, %v3065_v31 }
 0x1b1   : > { %v2657_v54 = vpop.eup %2656  ;;  %v1008_v55 = vadd.f32 1e-06, %v1005_v53 }
 0x1b2   : > { %v1011_v56 = vmul.f32 %v2657_v54, %v1007_v51  ;;  %vm1017_vm7 = vweird.f32 %v2657_v54 }
 0x1b3   : > { %2658 = vrsqrt.f32 %v1008_v55  ;;  %vm1018_vm9 = vmor %vm1016_vm8, %vm1017_vm7  ;;  %vm1026_vm11 = vweird.f32 %v1008_v55  ;;  %vm1180_vm7 = vcmask 57344   ;;  %vm1263_vm8 = vcmask 122944  }
 0x1b4   : > { %v1012_v57 = vmul.f32 %v2657_v54, %v1011_v56 }
 0x1b6   : > { %v1013_v58 = vmul.f32 0.5, %v1012_v57  ;;  %v1003_v59 = vpop.xlane.xlu1 %1002 }
 0x1b7   : > { %v1006_v60 = vmul.f32 %v1003_v59, %v3065_v31 }
 0x1b8   : > { %v1014_v61 = vsub.f32 1.5, %v1013_v58 }
 0x1b9   : > { %v2659_v62 = vpop.eup %2658  ;;  %v1009_v63 = vadd.f32 1e-06, %v1006_v60 }
 0x1ba   : > { %v1015_v0 = vmul.f32 %v2657_v54, %v1014_v61  ;;  %v1021_v1 = vmul.f32 %v2659_v62, %v1008_v55  ;;  %vm1027_vm10 = vweird.f32 %v2659_v62 }
 0x1bb   : > { %2660 = vrsqrt.f32 %v1009_v63  ;;  %vm1028_vm12 = vmor %vm1026_vm11, %vm1027_vm10  ;;  %vm1036_vm13 = vweird.f32 %v1009_v63  ;;  %vm1344_vm10 = vcmask 195712   ;;  %vm1346_vm11 = vcmask 188544  }
 0x1bc   : > { %v1022_v2 = vmul.f32 %v2659_v62, %v1021_v1  ;;  %v1019_v3 = vsel %vm1018_vm9, %v2657_v54, %v1015_v0  ;;  %vm1261_vm9 = vcmask 130112  }
 0x1bd   : > { %v1040_v7 = vmul.f32 %v1019_v3, %v989_v34 }
 0x1be   : > { %v1023_v4 = vmul.f32 0.5, %v1022_v2 }
 0x1bf   : > { %v1046_v14 = vmul.f32 %v2646_v8, %v1040_v7 }
 0x1c0   : > { %v1024_v5 = vsub.f32 1.5, %v1023_v4 }
 0x1c1   : > { %v2661_v6 = vpop.eup %2660  ;;  %v1052_v19 = vadd.f32 %v2647_v15, %v1046_v14 }
 0x1c2   : > { %v1025_v9 = vmul.f32 %v2659_v62, %v1024_v5  ;;  %v1031_v10 = vmul.f32 %v2661_v6, %v1009_v63  ;;  %vm1037_vm14 = vweird.f32 %v2661_v6 }
 0x1c3   : > { %vm1038_vm15 = vmor %vm1036_vm13, %vm1037_vm14  ;;  %vm1429_vm13 = vcmask 254144  }
 0x1c4   : > { %v1029_v11 = vsel %vm1028_vm12, %v2659_v62, %v1025_v9  ;;  %v1032_v12 = vmul.f32 %v2661_v6, %v1031_v10  ;;  %vm1427_vm12 = vcmask 261312  }
 0x1c5   : > { %v1041_v13 = vmul.f32 %v1029_v11, %v990_v39 }
 0x1c6   : > { %v1033_v16 = vmul.f32 0.5, %v1032_v12 }
 0x1c7   : > { %v1047_v17 = vmul.f32 %v2646_v8, %v1041_v13 }
 0x1c8   : > { %v1034_v18 = vsub.f32 1.5, %v1033_v16 }
 0x1c9   : > { %v1053_v20 = vadd.f32 %v2647_v15, %v1047_v17 }
 0x1ca   : > { %v1035_v21 = vmul.f32 %v2661_v6, %v1034_v18 }
 0x1cb   : > { %v1055_v22 = vpack.c.bf16 %v1053_v20, %v1052_v19 }
 0x1cc   : > { %v1039_v23 = vsel %vm1038_vm15, %v2661_v6, %v1035_v21 }
 0x1cd   : > { %2488 = vmatmul.msk.bf16.vlgmr.msra.gmra.mxu0 %vm968_vm4, %v1055_v22  ;;  %v1042_v24 = vmul.f32 %v1039_v23, %v991_v44  ;;  %v3111_v44 = vsel %vm1159_vm2, %v1160_v43, 0 }
 0x1cf   : > { %v1048_v25 = vmul.f32 %v2646_v8, %v1042_v24 }
 0x1d1   : > { %v1054_v26 = vadd.f32 %v2647_v15, %v1048_v25 }
 0x1d3   : > { %v1056_v27 = vpack.c.bf16 %v1054_v26, %v1054_v26 }
 0x1dd   : > { %2489 = vmatmul.msk.bf16.gmra.mxu0 %vm968_vm4, %v1056_v27 }
 0x24a   : > { %v1092_v28 = vpop.f32.mrf.mxu0 }
 0x24b   : > { %v1093_v32 = vadd.f32 %v2648_v29, %v1092_v28 }
 0x252   : > { %v1094_v30 = vpop.f32.mrf.mxu0 }
 0x253   : > { %v1095_v33 = vadd.f32 %v2648_v29, %v1094_v30 }
 0x255   : > { %v3095_v34 = vpack.c.bf16 %v1095_v33, %v1093_v32 }
 0x257   : > { %1231 = vrot.lane.b32.xlu0 %v3095_v34, %s2826_s4  ;;  %1184 = vrot.lane.b32.xlu2 %v3095_v34, %s2827_s25 }
 0x258   : > { %1103 = vrot.lane.b32.xlu1 %v3095_v34, %s2828_s28 }
 0x25a   : > { %v1097_v35 = vpop.f32.mrf.mxu0 }
 0x25b   : > { %v1098_v36 = vadd.f32 %v2648_v29, %v1097_v35 }
 0x25d   : > { %v1431_v37 = vpack.c.bf16 %v1098_v36, %v1095_v33 }
 0x25f   : > { %1182 = vrot.lane.b32.xlu2 %v3095_v34, %s2829_s24  ;;  %v1435_v57 = vshll.u32 %v1431_v37, 16  ;;  %v1433_v59 = vshrl.u32 %v1431_v37, 16 }
 0x260   : > { %1267 = vrot.lane.b32.xlu1 %v3095_v34, %s2830_s9 }
 0x261   : > { %v1437_v58 = vrot.slane %v1435_v57, 1 }
 0x262   : > { %v1099_v38 = vpop.f32.mrf.mxu0 }
 0x263   : > { %v3123_v60 = vor.u32 %v1437_v58, %v1433_v59 }
 0x268   : > { %1348 = vrot.lane.b32.xlu1 %v3095_v34, %s2831_s29 }
 0x2b1   : > { %v1185_v39 = vpop.permute.xlu2 %1184 }
 0x2b2   : > { %v1190_v40 = vsel %vm1105_vm0, %v1185_v39, 0 }
 0x2b3   : > { %1199 = vmatpush.bf16.xpose.msra.mxu3 %v1190_v40 }
 0x2b9   : > { %v1183_v41 = vpop.permute.xlu2 %1182 }
 0x2ba   : > { %2492 = vmatmul.msk.bf16.vlgmr.msra.gmra.mxu3 %vm1105_vm0, %v1183_v41 }
 0x2c9   : > { %v1232_v45 = vpop.permute.xlu0 %1231 }
 0x2ca   : > { %v1104_v46 = vpop.permute.xlu1 %1103  ;;  %v1237_v47 = vand.u32 %v1232_v45, %v3111_v44 }
 0x2cb   : > { %v1110_v48 = vsel %vm1105_vm0, %v1104_v46, 0 }
 0x2cc   : > { %1119 = vmatpush.bf16.xpose.msra.mxu1 %v1110_v48  ;;  %1246 = vmatpush.bf16.msra.mxu2 %v1237_v47 }
 0x2d2   : > { %v1268_v49 = vpop.permute.xlu1 %1267 }
 0x2d3   : > { %2490 = vmatmul.msk.bf16.vlgmr.msra.gmra.mxu1 %vm1105_vm0, %v3095_v34  ;;  %v1273_v50 = vsel %vm1105_vm0, %v1268_v49, 0 }
 0x2d4   : > { %1282 = vmatpush.bf16.xpose.msrb.mxu1 %v1273_v50 }
 0x2da   : > { %v1349_v16 = vpop.permute.xlu1 %1348 }
 0x33d   : > { %v1201_v51 = vpop.f32.mrf.mxu3 }
 0x33e   : > { %v1206_v52 = vmul.f32 0.35355338, %v1201_v51 }
 0x340   : > { %v1208_v53 = vsel %vm1128_vm3, %v1206_v52, -inf }
 0x341   : > { %1209 = vmax.xlane.f32.xlu2 %v1208_v53 }
 0x345   : > { %v1203_v54 = vpop.f32.mrf.mxu3 }
 0x346   : > { %v1207_v55 = vmul.f32 0.35355338, %v1203_v54 }
 0x348   : > { %v1211_v56 = vsel %vm1132_vm6, %v1207_v55, -inf }
 0x349   : > { %1212 = vmax.xlane.f32.xlu0 %v1211_v56 }
 0x350   : > { %v1121_v61 = vpop.f32.mrf.mxu1 }
 0x351   : > { %v3126_v62 = vmul.f32 0.35355338, %v1121_v61 }
 0x353   : > { %v1129_v63 = vsel %vm1128_vm3, %v3126_v62, -inf }
 0x358   : > { %v1123_v13 = vpop.f32.mrf.mxu1 }
 0x359   : > { %1350 = vrot.lane.b32.xlu2 %v3095_v34, %s2833_s7  ;;  %v1127_v14 = vmul.f32 0.35355338, %v1123_v13 }
 0x35b   : > { %v1133_v15 = vsel %vm1132_vm6, %v1127_v14, -inf }
 0x35d   : > { %1265 = vrot.lane.b32.xlu0 %v3095_v34, %s2834_s30 }
 0x361   : > { %1674 = vrot.lane.b32.xlu2 %v3123_v60, %s2833_s7 }
 0x38a   : > { %1130 = vmax.xlane.f32.xlu2 %v1129_v63 }
 0x3b4   : > { %v1210_v0 = vpop.xlane.xlu2 %1209 }
 0x3b5   : > { %v1214_v1 = vsub.f32 %v1206_v52, %v1210_v0 }
 0x3b7   : > { %v1216_v2 = vmul.f32 1.442695, %v1214_v1 }
 0x3b9   : > { %2662 = vpow2.f32 %v1216_v2 }
 0x3bc   : > { %v1351_v3 = vpop.permute.xlu2 %1350  ;;  %v1213_v4 = vpop.xlane.xlu0 %1212 }
 0x3bd   : > { %v1215_v5 = vsub.f32 %v1207_v55, %v1213_v4  ;;  %v1356_v6 = vsel %vm1105_vm0, %v1351_v3, 0 }
 0x3be   : > { %1365 = vmatpush.bf16.xpose.msrb.mxu2 %v1356_v6 }
 0x3bf   : > { %v2663_v7 = vpop.eup %2662  ;;  %v1218_v8 = vmul.f32 1.442695, %v1215_v5 }
 0x3c0   : > { %v1220_v9 = vsel %vm1128_vm3, %v2663_v7, 0.0 }
 0x3c1   : > { %2664 = vpow2.f32 %v1218_v8  ;;  %1221 = vadd.xlane.f32.xlu1 %v1220_v9 }
 0x3c4   : > { %v1675_v33 = vpop.permute.xlu2 %1674 }
 0x3c5   : > { %v1680_v38 = vsel %vm1105_vm0, %v1675_v33, 0 }
 0x3c7   : > { %v2665_v10 = vpop.eup %2664 }
 0x3c8   : > { %v1223_v11 = vsel %vm1132_vm6, %v2665_v10, 0.0 }
 0x3c9   : > { %1224 = vadd.xlane.f32.xlu0 %v1223_v11 }
 0x3cf   : > { %v1266_v12 = vpop.permute.xlu0 %1265 }
 0x3d0   : > { %2494 = vmatmul.msk.bf16.vlgmr.msrb.gmra.mxu1 %vm1105_vm0, %v1266_v12 }
 0x3da   : > { %1512 = vrot.lane.b32.xlu1 %v3123_v60, %s2827_s25  ;;  %s2837_s25 = smov 48  }
 0x3dd   : > { %1439 = vrot.lane.b32.xlu0 %v3123_v60, %s2828_s28  ;;  %s2838_s28 = smov 8  }
 0x3e2   : > { %1593 = vrot.lane.b32.xlu1 %v3123_v60, %s2830_s9 }
 0x3e5   : > { %1510 = vrot.lane.b32.xlu0 %v3123_v60, %s2829_s24  ;;  %s2840_s24 = smov 24  }
 0x3ea   : > { %1672 = vrot.lane.b32.xlu1 %v3123_v60, %s2831_s29  ;;  %s3560_s29 = scalar_lea.vmem %s3509_s10, %s2981_s27 }
 0x3ed   : > { %1591 = vrot.lane.b32.xlu0 %v3123_v60, %s2834_s30  ;;  %s3562_s30 = sld [smem:[#allocation22_spill]] (!%p2558_p5) }
 0x3fd   : > { %v1131_v56 = vpop.xlane.xlu2 %1130 }
 0x3fe   : > { %v1136_v59 = vsub.f32 %v3126_v62, %v1131_v56 }
 0x400   : > { %v1138_v63 = vmul.f32 1.442695, %v1136_v59 }
 0x417   : > { %1134 = vmax.xlane.f32.xlu0 %v1133_v15 }
 0x434   : > { %v1222_v17 = vpop.xlane.xlu1 %1221 }
 0x435   : > { %2666 = vrcp.f32 %v1222_v17 }
 0x43b   : > { %v2667_v19 = vpop.eup %2666 }
 0x43c   : > { %v1225_v18 = vpop.xlane.xlu0 %1224  ;;  %v1228_v21 = vmul.f32 %v2667_v19, %v2663_v7 }
 0x43d   : > { %2668 = vrcp.f32 %v1225_v18 }
 0x443   : > { %v2669_v20 = vpop.eup %2668 }
 0x444   : > { %v1229_v22 = vmul.f32 %v2669_v20, %v2665_v10 }
 0x446   : > { %v1230_v23 = vpack.c.bf16 %v1229_v22, %v1228_v21 }
 0x448   : > { %2493 = vmatmul.msk.bf16.vlgmr.msra.gmra.mxu2 %vm1128_vm3, %v1230_v23 }
 0x44c   : > { %v1513_v24 = vpop.permute.xlu1 %1512 }
 0x44d   : > { %v1518_v25 = vsel %vm1105_vm0, %v1513_v24, 0  ;;  %v1284_v26 = vpop.f32.mrf.mxu1 }
 0x44e   : > { %v3149_v27 = vmul.f32 0.35355338, %v1284_v26  ;;  %1527 = vmatpush.bf16.xpose.msra.mxu2 %v1518_v25 }
 0x44f   : > { %v1440_v28 = vpop.permute.xlu0 %1439 }
 0x450   : > { %v1445_v29 = vsel %vm1105_vm0, %v1440_v28, 0  ;;  %v1291_v30 = vsel %vm1128_vm3, %v3149_v27, -inf }
 0x451   : > { %1292 = vmax.xlane.f32.xlu1 %v1291_v30  ;;  %1454 = vmatpush.bf16.xpose.msra.mxu1 %v1445_v29 }
 0x454   : > { %v1594_v32 = vpop.permute.xlu1 %1593 }
 0x455   : > { %v1599_v35 = vsel %vm1105_vm0, %v1594_v32, 0  ;;  %v1286_v36 = vpop.f32.mrf.mxu1 }
 0x456   : > { %v1290_v37 = vmul.f32 0.35355338, %v1286_v36 }
 0x457   : > { %v1511_v40 = vpop.permute.xlu0 %1510 }
 0x458   : > { %2496 = vmatmul.msk.bf16.vlgmr.msrb.gmra.mxu2 %vm1105_vm0, %v1349_v16  ;;  %2498 = vmatmul.msk.bf16.vlgmr.msra.gmra.mxu1 %vm1105_vm0, %v3123_v60  ;;  %v1294_v39 = vsel %vm1132_vm6, %v1290_v37, -inf }
 0x459   : > { %1608 = vmatpush.bf16.xpose.msrb.mxu1 %v1599_v35  ;;  %1689 = vmatpush.bf16.xpose.msrb.mxu2 %v1680_v38 }
 0x45a   : > { %1295 = vmax.xlane.f32.xlu2 %v1294_v39 }
 0x45c   : > { %v1673_v42 = vpop.permute.xlu1 %1672 }
 0x45f   : > { %v1592_v41 = vpop.permute.xlu0 %1591 }
 0x468   : > { %2500 = vmatmul.msk.bf16.vlgmr.msra.gmra.mxu2 %vm1105_vm0, %v1511_v40  ;;  %2502 = vmatmul.msk.bf16.vlgmr.msrb.gmra.mxu1 %vm1105_vm0, %v1592_v41 }
 0x478   : > { %2504 = vmatmul.msk.bf16.vlgmr.msrb.gmra.mxu2 %vm1105_vm0, %v1673_v42 }
 0x48a   : > { %v1135_v43 = vpop.xlane.xlu0 %1134 }
 0x48b   : > { %v1137_v45 = vsub.f32 %v1127_v14, %v1135_v43 }
 0x48d   : > { %v1140_v46 = vmul.f32 1.442695, %v1137_v45 }
 0x48f   : > { %2670 = vpow2.f32 %v1140_v46 }
 0x490   : > { %2672 = vpow2.f32 %v1138_v63 }
 0x495   : > { %v3167_v50 = vpop.eup %2670 }
 0x496   : > { %v1145_v54 = vsel %vm1132_vm6, %v3167_v50, 0.0  ;;  %v3188_v4 = vpop.eup %2672 }
 0x497   : > { %v1142_v62 = vsel %vm1128_vm3, %v3188_v4, 0.0 }
 0x4c4   : > { %v1293_v16 = vpop.xlane.xlu1 %1292 }
 0x4cb   : > { %v3175_v55 = vpop.f32.mrf.mxu2 }
 0x4cd   : > { %v1296_v8 = vpop.xlane.xlu2 %1295 }
 0x4ce   : > { %v1298_v9 = vsub.f32 %v1290_v37, %v1296_v8 }
 0x4d0   : > { %v1301_v11 = vmul.f32 1.442695, %v1298_v9 }
 0x4d2   : > { %2674 = vpow2.f32 %v1301_v11 }
 0x4d3   : > { %v3182_v0 = vpop.f32.mrf.mxu2 }
 0x4d5   : > { %v1456_v47 = vpop.f32.mrf.mxu1 }
 0x4d6   : > { %v3163_v48 = vmul.f32 0.35355338, %v1456_v47 }
 0x4d8   : > { %v1463_v49 = vsel %vm1128_vm3, %v3163_v48, -inf  ;;  %v3198_v13 = vpop.eup %2674 }
 0x4d9   : > { %1464 = vmax.xlane.f32.xlu1 %v1463_v49  ;;  %v1306_v15 = vsel %vm1132_vm6, %v3198_v13, 0.0 }
 0x4db   : > { %v1367_v5 = vpop.f32.mrf.mxu2 }
 0x4dc   : > { %v3200_v14 = vmul.f32 0.35355338, %v1367_v5 }
 0x4dd   : > { %v1458_v51 = vpop.f32.mrf.mxu1 }
 0x4de   : > { %v3169_v52 = vmul.f32 0.35355338, %v1458_v51  ;;  %v1374_v17 = vsel %vm1128_vm3, %v3200_v14, -inf }
 0x4e0   : > { %v1466_v53 = vsel %vm1132_vm6, %v3169_v52, -inf }
 0x4e1   : > { %1467 = vmax.xlane.f32.xlu0 %v1466_v53  ;;  %1146 = vadd.xlane.f32.xlu1 %v1145_v54 }
 0x4e3   : > { %v1369_v6 = vpop.f32.mrf.mxu2 }
 0x4e4   : > { %v3215_v24 = vmul.f32 0.35355338, %v1369_v6 }
 0x4e5   : > { %v1610_v57 = vpop.f32.mrf.mxu1 }
 0x4e6   : > { %v3177_v58 = vmul.f32 0.35355338, %v1610_v57  ;;  %v1377_v25 = vsel %vm1132_vm6, %v3215_v24, -inf }
 0x4e8   : > { %v1617_v61 = vsel %vm1128_vm3, %v3177_v58, -inf }
 0x4e9   : > { %1618 = vmax.xlane.f32.xlu0 %v1617_v61 }
 0x4eb   : > { %v1529_v7 = vpop.f32.mrf.mxu2 }
 0x4ec   : > { %v3225_v36 = vmul.f32 0.35355338, %v1529_v7 }
 0x4ed   : > { %v1612_v1 = vpop.f32.mrf.mxu1 }
 0x4ee   : > { %v3184_v2 = vmul.f32 0.35355338, %v1612_v1  ;;  %v1536_v38 = vsel %vm1128_vm3, %v3225_v36, -inf }
 0x4f0   : > { %v1620_v3 = vsel %vm1132_vm6, %v3184_v2, -inf }
 0x4f1   : > { %1621 = vmax.xlane.f32.xlu2 %v1620_v3 }
 0x4f3   : > { %v1531_v10 = vpop.f32.mrf.mxu2 }
 0x4f4   : > { %v3233_v40 = vmul.f32 0.35355338, %v1531_v10 }
 0x4f6   : > { %v1539_v45 = vsel %vm1132_vm6, %v3233_v40, -inf }
 0x4f9   : > { %1143 = vadd.xlane.f32.xlu2 %v1142_v62 }
 0x4fa   : > { %1397 = vrot.lane.b32.xlu1 %v3095_v34, %s2835_s23 }
 0x4fb   : > { %v1691_v12 = vpop.f32.mrf.mxu2 }
 0x4fc   : > { %v3237_v46 = vmul.f32 0.35355338, %v1691_v12 }
 0x4fd   : > { %1153 = vrot.lane.b32.xlu0 %v3095_v34, %s2836_s8 }
 0x503   : > { %v1693_v18 = vpop.f32.mrf.mxu2 }
 0x504   : > { %v3207_v19 = vmul.f32 0.35355338, %v1693_v18 }
 0x506   : > { %v1701_v21 = vsel %vm1132_vm6, %v3207_v19, -inf }
 0x511   : > { %1314 = vrot.lane.b32.xlu2 %v3095_v34, %s2837_s25  ;;  %v1297_v34 = vsub.f32 %v3149_v27, %v1293_v16 }
 0x513   : > { %v1299_v20 = vmul.f32 1.442695, %v1297_v34 }
 0x515   : > { %2676 = vpow2.f32 %v1299_v20 }
 0x51b   : > { %v3211_v22 = vpop.eup %2676 }
 0x51c   : > { %v1303_v23 = vsel %vm1128_vm3, %v3211_v22, 0.0 }
 0x524   : > { %1307 = vadd.xlane.f32.xlu1 %v1306_v15 }
 0x527   : > { %1375 = vmax.xlane.f32.xlu0 %v1374_v17 }
 0x52f   : > { %1702 = vmax.xlane.f32.xlu0 %v1701_v21 }
 0x53a   : > { %1304 = vadd.xlane.f32.xlu2 %v1303_v23 }
 0x542   : > { %1378 = vmax.xlane.f32.xlu2 %v1377_v25 }
 0x54c   : > { %v1465_v26 = vpop.xlane.xlu1 %1464 }
 0x54d   : > { %v1469_v27 = vsub.f32 %v3163_v48, %v1465_v26 }
 0x54f   : > { %v1471_v28 = vmul.f32 1.442695, %v1469_v27 }
 0x551   : > { %2678 = vpow2.f32 %v1471_v28 }
 0x554   : > { %v1468_v29 = vpop.xlane.xlu0 %1467  ;;  %v1147_v42 = vpop.xlane.xlu1 %1146 }
 0x555   : > { %v1470_v30 = vsub.f32 %v3169_v52, %v1468_v29  ;;  %v1698_v52 = vsel %vm1128_vm3, %v3237_v46, -inf }
 0x557   : > { %v3221_v32 = vpop.eup %2678  ;;  %v1473_v33 = vmul.f32 1.442695, %v1470_v30 }
 0x558   : > { %v1475_v35 = vsel %vm1128_vm3, %v3221_v32, 0.0 }
 0x559   : > { %2680 = vpow2.f32 %v1473_v33  ;;  %1476 = vadd.xlane.f32.xlu2 %v1475_v35 }
 0x55a   : > { %2682 = vrcp.f32 %v1147_v42 }
 0x55c   : > { %v1619_v43 = vpop.xlane.xlu0 %1618 }
 0x55d   : > { %v1623_v62 = vsub.f32 %v3177_v58, %v1619_v43 }
 0x55f   : > { %v3227_v37 = vpop.eup %2680  ;;  %v1625_v7 = vmul.f32 1.442695, %v1623_v62 }
 0x560   : > { %v1478_v39 = vsel %vm1132_vm6, %v3227_v37, 0.0  ;;  %v2683_v53 = vpop.eup %2682 }
 0x561   : > { %1537 = vmax.xlane.f32.xlu2 %v1536_v38  ;;  %1479 = vadd.xlane.f32.xlu1 %v1478_v39  ;;  %v1151_v57 = vmul.f32 %v2683_v53, %v3167_v50 }
 0x564   : > { %v1622_v41 = vpop.xlane.xlu2 %1621 }
 0x565   : > { %v1624_v50 = vsub.f32 %v3184_v2, %v1622_v41 }
 0x567   : > { %v1627_v9 = vmul.f32 1.442695, %v1624_v50 }
 0x569   : > { %1540 = vmax.xlane.f32.xlu1 %v1539_v45 }
 0x56c   : > { %v1144_v47 = vpop.xlane.xlu2 %1143  ;;  %v1398_v48 = vpop.permute.xlu1 %1397 }
 0x56d   : > { %2684 = vrcp.f32 %v1144_v47  ;;  %v1403_v54 = vand.u32 %v1398_v48, %v3111_v44 }
 0x56f   : > { %v1154_v49 = vpop.permute.xlu0 %1153 }
 0x570   : > { %v1163_v51 = vand.u32 %v3111_v44, %v1154_v49 }
 0x571   : > { %1699 = vmax.xlane.f32.xlu1 %v1698_v52 }
 0x572   : > { %1172 = vmatpush.bf16.msrb.mxu0 %v1163_v51 }
 0x573   : > { %v2685_v56 = vpop.eup %2684 }
 0x574   : > { %v1150_v59 = vmul.f32 %v2685_v56, %v3188_v4  ;;  %v1315_v61 = vpop.permute.xlu2 %1314 }
 0x575   : > { %v1320_v63 = vand.u32 %v1315_v61, %v3111_v44 }
 0x576   : > { %1412 = vmatpush.bf16.msra.mxu0 %v1403_v54  ;;  %v1152_v1 = vpack.c.bf16 %v1151_v57, %v1150_v59 }
 0x577   : > { %1329 = vmatpush.bf16.msrb.mxu3 %v1320_v63 }
 0x578   : > { %2491 = vmatmul.msk.bf16.vlgmr.msrb.gmra.mxu0 %vm1128_vm3, %v1152_v1 }
 0x597   : > { %v1308_v10 = vpop.xlane.xlu1 %1307 }
 0x59a   : > { %v1376_v3 = vpop.xlane.xlu0 %1375 }
 0x59b   : > { %v1380_v5 = vsub.f32 %v3200_v14, %v1376_v3 }
 0x59d   : > { %v1382_v6 = vmul.f32 1.442695, %v1380_v5 }
 0x59f   : > { %2686 = vpow2.f32 %v1382_v6 }
 0x5a0   : > { %2688 = vpow2.f32 %v1625_v7 }
 0x5a1   : > { %2690 = vrcp.f32 %v1308_v10 }
 0x5a2   : > { %2692 = vpow2.f32 %v1627_v9  ;;  %v1703_v45 = vpop.xlane.xlu0 %1702 }
 0x5a5   : > { %v3249_v8 = vpop.eup %2686 }
 0x5a6   : > { %v1386_v4 = vsel %vm1128_vm3, %v3249_v8, 0.0  ;;  %v3254_v11 = vpop.eup %2688 }
 0x5a7   : > { %1387 = vadd.xlane.f32.xlu1 %v1386_v4  ;;  %v1629_v58 = vsel %vm1128_vm3, %v3254_v11, 0.0  ;;  %v2691_v14 = vpop.eup %2690 }
 0x5a8   : > { %v3258_v15 = vpop.eup %2692  ;;  %v1312_v16 = vmul.f32 %v2691_v14, %v3198_v13 }
 0x5a9   : > { %v1632_v20 = vsel %vm1132_vm6, %v3258_v15, 0.0 }
 0x5ad   : > { %v1305_v12 = vpop.xlane.xlu2 %1304 }
 0x5ae   : > { %2694 = vrcp.f32 %v1305_v12 }
 0x5af   : > { %1630 = vadd.xlane.f32.xlu1 %v1629_v58 }
 0x5b4   : > { %v2695_v2 = vpop.eup %2694 }
 0x5b5   : > { %v1311_v17 = vmul.f32 %v2695_v2, %v3211_v22  ;;  %v1379_v18 = vpop.xlane.xlu2 %1378 }
 0x5b6   : > { %v1381_v34 = vsub.f32 %v3215_v24, %v1379_v18 }
 0x5b7   : > { %1633 = vadd.xlane.f32.xlu1 %v1632_v20  ;;  %v1313_v21 = vpack.c.bf16 %v1312_v16, %v1311_v17 }
 0x5b8   : > { %v1384_v23 = vmul.f32 1.442695, %v1381_v34 }
 0x5b9   : > { %2495 = vmatmul.msk.bf16.vlgmr.msrb.gmra.mxu3 %vm1128_vm3, %v1313_v21 }
 0x5ba   : > { %2696 = vpow2.f32 %v1384_v23 }
 0x5c0   : > { %v2697_v25 = vpop.eup %2696 }
 0x5c1   : > { %v1389_v26 = vsel %vm1132_vm6, %v2697_v25, 0.0 }
 0x5c2   : > { %1390 = vadd.xlane.f32.xlu0 %v1389_v26 }
 0x5cc   : > { %v1477_v27 = vpop.xlane.xlu2 %1476 }
 0x5cd   : > { %2698 = vrcp.f32 %v1477_v27 }
 0x5d0   : > { %1640 = vrot.lane.b32.xlu1 %v3123_v60, %s2837_s25  ;;  %s3564_s25 = sld [smem:[#allocation24_spill]] (!%p2558_p5) }
 0x5d3   : > { %v2699_v29 = vpop.eup %2698 }
 0x5d4   : > { %v1538_v13 = vpop.xlane.xlu2 %1537  ;;  %v1480_v22 = vpop.xlane.xlu1 %1479  ;;  %v1483_v33 = vmul.f32 %v2699_v29, %v3221_v32  ;;  %v1705_v32 = vsub.f32 %v3207_v19, %v1703_v45 }
 0x5d5   : > { %v1542_v24 = vsub.f32 %v3225_v36, %v1538_v13  ;;  %2700 = vrcp.f32 %v1480_v22 }
 0x5d6   : > { %1486 = vrot.lane.b32.xlu0 %v3123_v60, %s2836_s8  ;;  %s3561_s8 = scalar_lea.vmem %s3515_s16, %s2981_s27 }
 0x5d7   : > { %v1544_v28 = vmul.f32 1.442695, %v1542_v24 }
 0x5d8   : > { %1721 = vrot.lane.b32.xlu1 %v3123_v60, %s2835_s23 }
 0x5d9   : > { %2702 = vpow2.f32 %v1544_v28 }
 0x5db   : > { %v2701_v30 = vpop.eup %2700 }
 0x5dc   : > { %v1484_v35 = vmul.f32 %v2701_v30, %v3227_v37  ;;  %v1541_v41 = vpop.xlane.xlu1 %1540  ;;  %v1708_v37 = vmul.f32 1.442695, %v1705_v32 }
 0x5dd   : > { %v1543_v42 = vsub.f32 %v3233_v40, %v1541_v41 }
 0x5de   : > { %v1485_v38 = vpack.c.bf16 %v1484_v35, %v1483_v33 }
 0x5df   : > { %v3276_v39 = vpop.eup %2702  ;;  %v1546_v43 = vmul.f32 1.442695, %v1543_v42 }
 0x5e0   : > { %1257 = vrot.lane.b32.xlu1 %v3182_v0, %s2838_s28  ;;  %v1548_v36 = vsel %vm1128_vm3, %v3276_v39, 0.0 }
 0x5e1   : > { %1549 = vadd.xlane.f32.xlu2 %v1548_v36  ;;  %2704 = vpow2.f32 %v1546_v43 }
 0x5e2   : > { %2706 = vpow2.f32 %v1708_v37 }
 0x5e4   : > { %v1700_v51 = vpop.xlane.xlu1 %1699 }
 0x5e7   : > { %v3287_v0 = vpop.eup %2704 }
 0x5e8   : > { %v1551_v40 = vsel %vm1132_vm6, %v3287_v0, 0.0  ;;  %v3292_v49 = vpop.eup %2706 }
 0x5e9   : > { %v1713_v19 = vsel %vm1132_vm6, %v3292_v49, 0.0 }
 0x5f5   : > { %v1174_v47 = vpop.f32.mrf.mxu0 }
 0x5f6   : > { %1179 = vst.msk [vmem:[#allocation3] sm:$0xff] %vm1105_vm0, %v1174_v47 }
 0x5f9   : > { %1559 = vrot.lane.b32.xlu2 %v3123_v60, %s2826_s4  ;;  %v1704_v60 = vsub.f32 %v3237_v46, %v1700_v51  ;;  %s2839_s4 = smov 16  }
 0x5fb   : > { %v1706_v52 = vmul.f32 1.442695, %v1704_v60 }
 0x5fd   : > { %v1176_v48 = vpop.f32.mrf.mxu0  ;;  %2708 = vpow2.f32 %v1706_v52 }
 0x5fe   : > { %1181 = vst.msk [vmem:[#allocation3 + $0x8] sm:$0x1] %vm1180_vm7, %v1176_v48 }
 0x600   : > { %1552 = vadd.xlane.f32.xlu0 %v1551_v40  ;;  %v2590_v40 = vld [vmem:[%s3004_s18 + $0x8] sm:$0xff] }
 0x601   : > { %1790 = vmatpush.bf16.msra.mxu1 %v2590_v40 }
 0x603   : > { %v3299_v53 = vpop.eup %2708 }
 0x604   : > { %v1710_v54 = vsel %vm1128_vm3, %v3299_v53, 0.0 }
 0x608   : > { %1714 = vadd.xlane.f32.xlu0 %v1713_v19 }
 0x61a   : > { %v1388_v56 = vpop.xlane.xlu1 %1387 }
 0x61b   : > { %2710 = vrcp.f32 %v1388_v56 }
 0x61c   : > { %1255 = vrot.lane.b32.xlu0 %v3175_v55, %s2838_s28 }
 0x621   : > { %v2711_v61 = vpop.eup %2710 }
 0x622   : > { %1711 = vadd.xlane.f32.xlu2 %v1710_v54  ;;  %v1631_v57 = vpop.xlane.xlu1 %1630  ;;  %v1394_v3 = vmul.f32 %v2711_v61, %v3249_v8 }
 0x62a   : > { %v1634_v63 = vpop.xlane.xlu1 %1633 }
 0x635   : > { %v1391_v59 = vpop.xlane.xlu0 %1390 }
 0x636   : > { %2712 = vrcp.f32 %v1391_v59 }
 0x637   : > { %2714 = vrcp.f32 %v1634_v63  ;;  %v2649_v63 = vld [vmem:[%s3560_s29] ss:$0 sm:$0xff] }
 0x638   : > { %2716 = vrcp.f32 %v1631_v57 }
 0x63c   : > { %v2713_v1 = vpop.eup %2712  ;;  %v1331_v46 = vpop.f32.mrf.mxu3 }
 0x63d   : > { %v1395_v5 = vmul.f32 %v2713_v1, %v2697_v25  ;;  %1338 = vrot.lane.b32.xlu2 %v1331_v46, %s2839_s4  ;;  %v2715_v12 = vpop.eup %2714 }
 0x63e   : > { %v2717_v58 = vpop.eup %2716  ;;  %v1638_v14 = vmul.f32 %v2715_v12, %v3258_v15 }
 0x63f   : > { %v1396_v55 = vpack.c.bf16 %v1395_v5, %v1394_v3  ;;  %v1637_v2 = vmul.f32 %v2717_v58, %v3254_v11  ;;  %v2744_v3 = vld [vmem:[#allocation2] sm:$0xff] }
 0x641   : > { %2497 = vmatmul.msk.bf16.vlgmr.msra.gmra.mxu0 %vm1128_vm3, %v1396_v55  ;;  %v1639_v16 = vpack.c.bf16 %v1638_v14, %v1637_v2 }
 0x642   : > { %v1641_v62 = vpop.permute.xlu1 %1640 }
 0x643   : > { %v1646_v4 = vand.u32 %v1641_v62, %v3111_v44 }
 0x644   : > { %v1333_v6 = vpop.f32.mrf.mxu3 }
 0x645   : > { %1340 = vrot.lane.b32.xlu0 %v1333_v6, %s2839_s4 }
 0x648   : > { %v1487_v7 = vpop.permute.xlu0 %1486 }
 0x649   : > { %v1492_v50 = vand.u32 %v1487_v7, %v3111_v44  ;;  %v2745_v7 = vld [vmem:[#allocation2 + $0x8] sm:$0xff] }
 0x64a   : > { %v1722_v9 = vpop.permute.xlu1 %1721 }
 0x64b   : > { %1501 = vmatpush.bf16.msra.mxu3 %v1492_v50  ;;  %v1727_v34 = vand.u32 %v1722_v9, %v3111_v44 }
 0x64e   : > { %2499 = vmatmul.msk.bf16.vlgmr.msra.gmra.mxu3 %vm1128_vm3, %v1485_v38 }
 0x64f   : > { %1655 = vmatpush.bf16.msrb.mxu3 %v1646_v4 }
 0x652   : > { %v1258_v8 = vpop.permute.xlu1 %1257 }
 0x653   : > { %1264 = vst.msk [vmem:[#allocation3 + $0x8] sm:$0x1] %vm1263_vm8, %v1258_v8 }
 0x654   : > { %v1550_v10 = vpop.xlane.xlu2 %1549 }
 0x655   : > { %2718 = vrcp.f32 %v1550_v10  ;;  %v2746_v10 = vld [vmem:[#allocation2 + $0x10] sm:$0x3] }
 0x65b   : > { %v2719_v21 = vpop.eup %2718 }
 0x65c   : > { %v1560_v17 = vpop.permute.xlu2 %1559  ;;  %v1556_v25 = vmul.f32 %v2719_v21, %v3276_v39 }
 0x65d   : > { %v1565_v18 = vand.u32 %v1560_v17, %v3111_v44 }
 0x65e   : > { %2503 = vmatmul.msk.bf16.vlgmr.msrb.gmra.mxu3 %vm1128_vm3, %v1639_v16 }
 0x65f   : > { %1574 = vmatpush.bf16.msrb.mxu0 %v1565_v18 }
 0x663   : > { %1736 = vmatpush.bf16.msra.mxu0 %v1727_v34 }
 0x673   : > { %v1553_v20 = vpop.xlane.xlu0 %1552 }
 0x674   : > { %2720 = vrcp.f32 %v1553_v20 }
 0x67a   : > { %v2721_v23 = vpop.eup %2720 }
 0x67b   : > { %v1557_v15 = vmul.f32 %v2721_v23, %v3287_v0  ;;  %v1715_v26 = vpop.xlane.xlu0 %1714 }
 0x67c   : > { %2722 = vrcp.f32 %v1715_v26 }
 0x67d   : > { %v1558_v11 = vpack.c.bf16 %v1557_v15, %v1556_v25 }
 0x67f   : > { %2501 = vmatmul.msk.bf16.vlgmr.msrb.gmra.mxu0 %vm1128_vm3, %v1558_v11 }
 0x682   : > { %v2723_v13 = vpop.eup %2722 }
 0x683   : > { %v1719_v24 = vmul.f32 %v2723_v13, %v3292_v49  ;;  %v2589_v49 = vld [vmem:[%s3004_s18] sm:$0xff] }
 0x684   : > { %1791 = vmatpush.bf16.msra.mxu1 %v2589_v49 }
 0x68e   : > { %v1256_v27 = vpop.permute.xlu0 %1255 }
 0x68f   : > { %1262 = vst.msk [vmem:[#allocation3] sm:$0xff] %vm1261_vm9, %v1256_v27 }
 0x695   : > { %v1712_v44 = vpop.xlane.xlu2 %1711 }
 0x696   : > { %2724 = vrcp.f32 %v1712_v44 }
 0x69c   : > { %v2725_v22 = vpop.eup %2724 }
 0x69d   : > { %v1718_v28 = vmul.f32 %v2725_v22, %v3299_v53  ;;  %v1339_v29 = vpop.permute.xlu2 %1338  ;;  %v2592_v22 = vld [vmem:[%s3021_s6 + $0x8] sm:$0xff] }
 0x69e   : > { %1345 = vst.msk [vmem:[#allocation3] sm:$0xff] %vm1344_vm10, %v1339_v29  ;;  %1919 = vmatpush.bf16.msra.mxu3 %v2592_v22 }
 0x69f   : > { %v1720_v30 = vpack.c.bf16 %v1719_v24, %v1718_v28 }
 0x6a1   : > { %2505 = vmatmul.msk.bf16.vlgmr.msra.gmra.mxu0 %vm1128_vm3, %v1720_v30  ;;  %v2591_v30 = vld [vmem:[%s3021_s6] sm:$0xff] }
 0x6a2   : > { %1920 = vmatpush.bf16.msra.mxu3 %v2591_v30 }
 0x6b7   : > { %v1341_v33 = vpop.permute.xlu0 %1340 }
 0x6b8   : > { %1347 = vst.msk [vmem:[#allocation3 + $0x8] sm:$0x1] %vm1346_vm11, %v1341_v33 }
 0x6be   : > { %v1414_v35 = vpop.f32.mrf.mxu0 }
 0x6bf   : > { %1421 = vrot.lane.b32.xlu0 %v1414_v35, %s2840_s24 }
 0x6c6   : > { %v1416_v42 = vpop.f32.mrf.mxu0 }
 0x6d1   : > { %v1503_v38 = vpop.f32.mrf.mxu3 }
 0x6d2   : > { %1508 = vst.msk [vmem:[#allocation3 + $0x9] sm:$0xff] %vm1105_vm0, %v1503_v38 }
 0x6d9   : > { %v1505_v39 = vpop.f32.mrf.mxu3 }
 0x6da   : > { %1509 = vst.msk [vmem:[#allocation3 + $0x11] sm:$0x1] %vm1180_vm7, %v1505_v39 }
 0x6e1   : > { %v1657_v36 = vpop.f32.mrf.mxu3 }
 0x6e2   : > { %1664 = vrot.lane.b32.xlu1 %v1657_v36, %s2839_s4 }
 0x6e9   : > { %v1659_v41 = vpop.f32.mrf.mxu3 }
 0x6ea   : > { %1666 = vrot.lane.b32.xlu2 %v1659_v41, %s2839_s4 }
 0x6fc   : > { %v1576_v43 = vpop.f32.mrf.mxu0 }
 0x6fd   : > { %1583 = vrot.lane.b32.xlu1 %v1576_v43, %s2838_s28 }
 0x704   : > { %v1578_v45 = vpop.f32.mrf.mxu0 }
 0x705   : > { %1423 = vrot.lane.b32.xlu1 %v1416_v42, %s2840_s24 }
 0x70d   : > { %1585 = vrot.lane.b32.xlu1 %v1578_v45, %s2838_s28 }
 0x71e   : > { %v1738_v47 = vpop.f32.mrf.mxu0 }
 0x71f   : > { %1745 = vrot.lane.b32.xlu0 %v1738_v47, %s2840_s24 }
 0x726   : > { %v1740_v32 = vpop.f32.mrf.mxu0 }
 0x727   : > { %1747 = vrot.lane.b32.xlu0 %v1740_v32, %s2840_s24 }
 0x731   : > { %v1422_v37 = vpop.permute.xlu0 %1421 }
 0x732   : > { %1428 = vst.msk [vmem:[#allocation3] sm:$0xff] %vm1427_vm12, %v1422_v37 }
 0x739   : > { %v1753_v54 = vld [vmem:[#allocation3] sm:$0xff] }
 0x744   : > { %v1667_v60 = vpop.permute.xlu2 %1666 }
 0x754   : > { %v1665_v0 = vpop.permute.xlu1 %1664 }
 0x76f   : > { %v1584_v48 = vpop.permute.xlu1 %1583 }
 0x770   : > { %1589 = vst.msk [vmem:[#allocation3 + $0x9] sm:$0xff] %vm1261_vm9, %v1584_v48 }
 0x771   : > { %1670 = vst.msk [vmem:[#allocation3 + $0x9] sm:$0xff] %vm1344_vm10, %v1665_v0 }
 0x777   : > { %v1424_v19 = vpop.permute.xlu1 %1423 }
 0x778   : > { %1430 = vst.msk [vmem:[#allocation3 + $0x8] sm:$0x1] %vm1429_vm13, %v1424_v19 }
 0x77f   : > { %v1586_v51 = vpop.permute.xlu1 %1585 }
 0x780   : > { %1590 = vst.msk [vmem:[#allocation3 + $0x11] sm:$0x1] %vm1263_vm8, %v1586_v51 }
 0x781   : > { %1671 = vst.msk [vmem:[#allocation3 + $0x11] sm:$0x1] %vm1346_vm11, %v1667_v60 }
 0x791   : > { %v1746_v52 = vpop.permute.xlu0 %1745 }
 0x792   : > { %1751 = vst.msk [vmem:[#allocation3 + $0x9] sm:$0xff] %vm1427_vm12, %v1746_v52  ;;  %v2650_v52 = vld [vmem:[%s875_s3] ss:$0 sm:$0xff] }
 0x799   : > { %v1748_v53 = vpop.permute.xlu0 %1747  ;;  %v1754_v56 = vld [vmem:[#allocation3 + $0x8] sm:$0xff] }
 0x79a   : > { %1752 = vst.msk [vmem:[#allocation3 + $0x11] sm:$0x1] %vm1429_vm13, %v1748_v53  ;;  %v1756_v57 = vpack.c.bf16 %v1754_v56, %v1753_v54 }
 0x79c   : > { %2514 = vmatmul.msk.bf16.vlgmr.msra.gmra.mxu1 %vm968_vm4, %v1756_v57 }
 0x7a1   : > { %v1755_v59 = vld [vmem:[#allocation3 + $0x10] sm:$0x3] }
 0x7a2   : > { %v1757_v61 = vpack.c.bf16 %v1755_v59, %v1755_v59 }
 0x7ac   : > { %2515 = vmatmul.msk.bf16.gmra.mxu1 %vm968_vm4, %v1757_v61  ;;  %v2651_v61 = vld [vmem:[%s878_s1] ss:$0 sm:$0xff] }
 0x819   : > { %v1793_v1 = vpop.f32.mrf.mxu1 }
 0x81a   : > { %v1794_v46 = vadd.f32 %v2649_v63, %v1793_v1 }
 0x81c   : > { %v3346_v5 = vadd.f32 %v2744_v3, %v1794_v46 }
 0x81e   : > { %v1807_v55 = vsel %vm968_vm4, %v3346_v5, 0.0 }
 0x81f   : > { %1808 = vadd.xlane.f32.xlu1 %v1807_v55 }
 0x821   : > { %v1795_v62 = vpop.f32.mrf.mxu1 }
 0x822   : > { %v1796_v6 = vadd.f32 %v2649_v63, %v1795_v62 }
 0x824   : > { %v3350_v50 = vadd.f32 %v2745_v7, %v1796_v6 }
 0x826   : > { %v1810_v4 = vsel %vm968_vm4, %v3350_v50, 0.0 }
 0x827   : > { %1811 = vadd.xlane.f32.xlu2 %v1810_v4 }
 0x829   : > { %v1798_v9 = vpop.f32.mrf.mxu1 }
 0x82a   : > { %v1799_v8 = vadd.f32 %v2649_v63, %v1798_v9 }
 0x82c   : > { %v3354_v12 = vadd.f32 %v2746_v10, %v1799_v8 }
 0x82e   : > { %v1813_v58 = vsel %vm975_vm5, %v3354_v12, 0.0 }
 0x82f   : > { %1814 = vadd.xlane.f32.xlu0 %v1813_v58 }
 0x831   : > { %v1800_v14 = vpop.f32.mrf.mxu1 }
 0x892   : > { %v1809_v2 = vpop.xlane.xlu1 %1808 }
 0x893   : > { %v1816_v16 = vmul.f32 %v1809_v2, %v3065_v31  ;;  %v2652_v2 = vld [vmem:[%s886_s5] ss:$0 sm:$0xff] }
 0x895   : > { %v1819_v17 = vsub.f32 %v3346_v5, %v1816_v16 }
 0x897   : > { %v1822_v18 = vmul.f32 %v1819_v17, %v1819_v17 }
 0x899   : > { %v1825_v34 = vsel %vm968_vm4, %v1822_v18, 0.0 }
 0x89a   : > { %v1812_v20 = vpop.xlane.xlu2 %1811  ;;  %1826 = vadd.xlane.f32.xlu1 %v1825_v34  ;;  %v2600_v34 = vld [vmem:[%s3031_s0 + $0x38] sm:$0xff] }
 0x89b   : > { %v1817_v21 = vmul.f32 %v1812_v20, %v3065_v31  ;;  %2121 = vmatpush.bf16.msra.mxu2 %v2600_v34 }
 0x89d   : > { %v1820_v23 = vsub.f32 %v3350_v50, %v1817_v21 }
 0x89f   : > { %v1823_v25 = vmul.f32 %v1820_v23, %v1820_v23 }
 0x8a1   : > { %v1828_v15 = vsel %vm968_vm4, %v1823_v25, 0.0 }
 0x8a2   : > { %1829 = vadd.xlane.f32.xlu2 %v1828_v15  ;;  %v1815_v11 = vpop.xlane.xlu0 %1814 }
 0x8a3   : > { %v1818_v26 = vmul.f32 %v1815_v11, %v3065_v31 }
 0x8a5   : > { %v1821_v27 = vsub.f32 %v3354_v12, %v1818_v26  ;;  %v2598_v26 = vld [vmem:[%s3031_s0 + $0x28] sm:$0xff] }
 0x8a7   : > { %v1824_v44 = vmul.f32 %v1821_v27, %v1821_v27 }
 0x8a9   : > { %v1831_v13 = vsel %vm975_vm5, %v1824_v44, 0.0 }
 0x8aa   : > { %1832 = vadd.xlane.f32.xlu0 %v1831_v13  ;;  %v2597_v13 = vld [vmem:[%s3031_s0 + $0x20] sm:$0xff] }
 0x90d   : > { %v1827_v24 = vpop.xlane.xlu1 %1826 }
 0x90e   : > { %v1834_v28 = vmul.f32 %v1827_v24, %v3065_v31 }
 0x910   : > { %v1837_v29 = vadd.f32 1e-06, %v1834_v28 }
 0x912   : > { %2726 = vrsqrt.f32 %v1837_v29  ;;  %vm1846_vm15 = vweird.f32 %v1837_v29 }
 0x915   : > { %v1830_v33 = vpop.xlane.xlu2 %1829 }
 0x916   : > { %v1835_v35 = vmul.f32 %v1830_v33, %v3065_v31 }
 0x918   : > { %v2727_v38 = vpop.eup %2726  ;;  %v1838_v39 = vadd.f32 1e-06, %v1835_v35 }
 0x919   : > { %v1841_v36 = vmul.f32 %v2727_v38, %v1837_v29  ;;  %vm1847_vm14 = vweird.f32 %v2727_v38 }
 0x91a   : > { %2728 = vrsqrt.f32 %v1838_v39  ;;  %vm1848_vm0 = vmor %vm1846_vm15, %vm1847_vm14  ;;  %vm1856_vm2 = vweird.f32 %v1838_v39 }
 0x91b   : > { %v1842_v41 = vmul.f32 %v2727_v38, %v1841_v36 }
 0x91d   : > { %v1843_v42 = vmul.f32 0.5, %v1842_v41  ;;  %v1833_v43 = vpop.xlane.xlu0 %1832 }
 0x91e   : > { %v1836_v45 = vmul.f32 %v1833_v43, %v3065_v31 }
 0x91f   : > { %v1844_v47 = vsub.f32 1.5, %v1843_v42 }
 0x920   : > { %v2729_v32 = vpop.eup %2728  ;;  %v1839_v37 = vadd.f32 1e-06, %v1836_v45 }
 0x921   : > { %v1845_v0 = vmul.f32 %v2727_v38, %v1844_v47  ;;  %v1851_v48 = vmul.f32 %v2729_v32, %v1838_v39  ;;  %vm1857_vm1 = vweird.f32 %v2729_v32  ;;  %v2595_v47 = vld [vmem:[%s3031_s0 + $0x10] sm:$0xff] }
 0x922   : > { %2730 = vrsqrt.f32 %v1839_v37  ;;  %vm1858_vm3 = vmor %vm1856_vm2, %vm1857_vm1  ;;  %vm1866_vm7 = vweird.f32 %v1839_v37 }
 0x923   : > { %v1852_v40 = vmul.f32 %v2729_v32, %v1851_v48  ;;  %v1849_v49 = vsel %vm1848_vm0, %v2727_v38, %v1845_v0  ;;  %v2596_v38 = vld [vmem:[%s3031_s0 + $0x18] sm:$0xff] }
 0x924   : > { %v1870_v53 = vmul.f32 %v1849_v49, %v1819_v17 }
 0x925   : > { %v1853_v19 = vmul.f32 0.5, %v1852_v40 }
 0x926   : > { %v1876_v63 = vmul.f32 %v2650_v52, %v1870_v53 }
 0x927   : > { %v1854_v51 = vsub.f32 1.5, %v1853_v19 }
 0x928   : > { %v2731_v60 = vpop.eup %2730  ;;  %v1882_v62 = vadd.f32 %v2651_v61, %v1876_v63 }
 0x929   : > { %v1855_v54 = vmul.f32 %v2729_v32, %v1854_v51  ;;  %v1861_v56 = vmul.f32 %v2731_v60, %v1839_v37  ;;  %vm1867_vm6 = vweird.f32 %v2731_v60 }
 0x92a   : > { %vm1868_vm8 = vmor %vm1866_vm7, %vm1867_vm6 }
 0x92b   : > { %v1859_v57 = vsel %vm1858_vm3, %v2729_v32, %v1855_v54  ;;  %v1862_v59 = vmul.f32 %v2731_v60, %v1861_v56 }
 0x92c   : > { %v1871_v1 = vmul.f32 %v1859_v57, %v1820_v23  ;;  %v2599_v23 = vld [vmem:[%s3031_s0 + $0x30] sm:$0xff] }
 0x92d   : > { %v1863_v46 = vmul.f32 0.5, %v1862_v59  ;;  %2122 = vmatpush.bf16.msra.mxu2 %v2599_v23 }
 0x92e   : > { %v1877_v3 = vmul.f32 %v2650_v52, %v1871_v1  ;;  %v2593_v1 = vld [vmem:[%s3031_s0] sm:$0xff] }
 0x92f   : > { %v1864_v55 = vsub.f32 1.5, %v1863_v46 }
 0x930   : > { %v1883_v6 = vadd.f32 %v2651_v61, %v1877_v3 }
 0x931   : > { %v1865_v7 = vmul.f32 %v2731_v60, %v1864_v55  ;;  %2123 = vmatpush.bf16.msra.mxu2 %v2598_v26 }
 0x932   : > { %v1885_v4 = vpack.c.bf16 %v1883_v6, %v1882_v62 }
 0x933   : > { %v1869_v9 = vsel %vm1868_vm8, %v2731_v60, %v1865_v7 }
 0x934   : > { %2524 = vmatmul.msk.bf16.vlgmr.msra.gmra.mxu3 %vm968_vm4, %v1885_v4  ;;  %v1872_v8 = vmul.f32 %v1869_v9, %v1821_v27 }
 0x935   : > { %2124 = vmatpush.bf16.msra.mxu2 %v2597_v13 }
 0x936   : > { %v1878_v10 = vmul.f32 %v2650_v52, %v1872_v8  ;;  %v2594_v52 = vld [vmem:[%s3031_s0 + $0x8] sm:$0xff]  ;;  %s3563_s0 = sld [smem:[#allocation23_spill]] (!%p2558_p5) }
 0x938   : > { %v1884_v58 = vadd.f32 %v2651_v61, %v1878_v10 }
 0x939   : > { %2125 = vmatpush.bf16.msra.mxu2 %v2596_v38 }
 0x93a   : > { %v1886_v14 = vpack.c.bf16 %v1884_v58, %v1884_v58 }
 0x93d   : > { %2126 = vmatpush.bf16.msra.mxu2 %v2595_v47 }
 0x941   : > { %2127 = vmatpush.bf16.msra.mxu2 %v2594_v52 }
 0x944   : > { %2525 = vmatmul.msk.bf16.gmra.mxu3 %vm968_vm4, %v1886_v14 }
 0x945   : > { %2128 = vmatpush.bf16.msra.mxu2 %v2593_v1 }
 0x9b7   : > { %v1922_v16 = vpop.f32.mrf.mxu3 }
 0x9b8   : > { %v3389_v17 = vadd.f32 %v2652_v2, %v1922_v16 }
 0x9ba   : > { %v3392_v18 = vmul.f32 0.70710677, %v3389_v17 }
 0x9bc   : > { %v1943_v20 = vand.u32 2147483647, %v3392_v18  ;;  %vm1937_vm7 = vcmp.ge.f32.partialorder %v3392_v18, 0.0 }
 0x9be   : > { %v1946_v21 = vmul.f32 0.3275911, %v1943_v20  ;;  %v2024_v51 = vsub.f32 0.0, %v1943_v20 }
 0x9bf   : > { %v1924_v25 = vpop.f32.mrf.mxu3 }
 0x9c0   : > { %v1949_v15 = vadd.f32 1.0, %v1946_v21  ;;  %v3397_v11 = vadd.f32 %v2652_v2, %v1924_v25  ;;  %v2027_v59 = vmul.f32 %v2024_v51, %v1943_v20 }
 0x9c2   : > { %2732 = vrcp.f32 %v1949_v15  ;;  %v3401_v27 = vmul.f32 0.70710677, %v3397_v11  ;;  %v1963_v36 = vand.u32 2147483648, %v1949_v15  ;;  %v1961_v43 = vand.u32 2147483647, %v1949_v15 }
 0x9c3   : > { %vm1957_vm10 = vweird.f32 %v1949_v15  ;;  %v2030_v4 = vmul.f32 1.442695, %v2027_v59 }
 0x9c4   : > { %v3404_v44 = vand.u32 2147483647, %v3401_v27  ;;  %v1964_v0 = vor.u32 1.1754944e-38, %v1963_v36  ;;  %vm1962_vm12 = vcmp.eq.f32.partialorder %v1961_v43, 8.507059e+37  ;;  %vm1938_vm8 = vcmp.ge.f32.partialorder %v3401_v27, 0.0 }
 0x9c6   : > { %v1947_v22 = vmul.f32 0.3275911, %v3404_v44  ;;  %v2025_v58 = vsub.f32 0.0, %v3404_v44 }
 0x9c7   : > { %v1927_v24 = vpop.f32.mrf.mxu3 }
 0x9c8   : > { %v2733_v28 = vpop.eup %2732  ;;  %v3408_v29 = vadd.f32 %v2652_v2, %v1927_v24  ;;  %v1950_v33 = vadd.f32 1.0, %v1947_v22 }
 0x9c9   : > { %v1953_v30 = vmul.f32 %v2733_v28, %v1949_v15  ;;  %vm1958_vm9 = vweird.f32 %v2733_v28  ;;  %v2028_v15 = vmul.f32 %v2025_v58, %v3404_v44 }
 0x9ca   : > { %v3411_v35 = vmul.f32 0.70710677, %v3408_v29  ;;  %2734 = vrcp.f32 %v1950_v33  ;;  %vm1959_vm11 = vmor %vm1957_vm10, %vm1958_vm9  ;;  %v1978_v57 = vand.u32 2147483648, %v1950_v33  ;;  %v1976_v63 = vand.u32 2147483647, %v1950_v33 }
 0x9cb   : > { %v1954_v39 = vsub.f32 1.0, %v1953_v30  ;;  %vm1972_vm14 = vweird.f32 %v1950_v33  ;;  %v2032_v36 = vmul.f32 1.442695, %v2028_v15 }
 0x9cc   : > { %v3415_v41 = vand.u32 2147483647, %v3411_v35  ;;  %v1979_v6 = vor.u32 1.1754944e-38, %v1978_v57  ;;  %vm1977_vm0 = vcmp.eq.f32.partialorder %v1976_v63, 8.507059e+37  ;;  %vm1939_vm9 = vcmp.ge.f32.partialorder %v3411_v35, 0.0 }
 0x9cd   : > { %v1955_v42 = vmul.f32 %v2733_v28, %v1954_v39 }
 0x9ce   : > { %v1948_v45 = vmul.f32 0.3275911, %v3415_v41 }
 0x9cf   : > { %v1956_v32 = vadd.f32 %v2733_v28, %v1955_v42  ;;  %v1929_v37 = vpop.f32.mrf.mxu3 }
 0x9d0   : > { %v1951_v48 = vadd.f32 1.0, %v1948_v45  ;;  %v2735_v40 = vpop.eup %2734 }
 0x9d1   : > { %v1960_v49 = vsel %vm1959_vm11, %v2733_v28, %v1956_v32  ;;  %v1968_v60 = vmul.f32 %v2735_v40, %v1950_v33  ;;  %vm1973_vm13 = vweird.f32 %v2735_v40  ;;  %v2026_v33 = vsub.f32 0.0, %v3415_v41 }
 0x9d2   : > { %v1965_v19 = vsel %vm1962_vm12, %v1964_v0, %v1960_v49  ;;  %2736 = vrcp.f32 %v1951_v48  ;;  %vm1974_vm15 = vmor %vm1972_vm14, %vm1973_vm13  ;;  %v1993_v16 = vand.u32 2147483648, %v1951_v48  ;;  %v1991_v21 = vand.u32 2147483647, %v1951_v48 }
 0x9d3   : > { %v1997_v53 = vmul.f32 1.0614054, %v1965_v19  ;;  %v1969_v54 = vsub.f32 1.0, %v1968_v60  ;;  %2738 = vpow2.f32 %v2030_v4  ;;  %vm1987_vm2 = vweird.f32 %v1951_v48 }
 0x9d4   : > { %v1994_v22 = vor.u32 1.1754944e-38, %v1993_v16  ;;  %vm1992_vm6 = vcmp.eq.f32.partialorder %v1991_v21, 8.507059e+37  ;;  %v2029_v37 = vmul.f32 %v2026_v33, %v3415_v41  ;;  %2740 = vpow2.f32 %v2032_v36 }
 0x9d5   : > { %v2000_v56 = vadd.f32 -1.4531521, %v1997_v53  ;;  %v1970_v61 = vmul.f32 %v2735_v40, %v1969_v54  ;;  %v2841_v54 = vmov -1.0  }
 0x9d6   : > { %v2034_v60 = vmul.f32 1.442695, %v2029_v37  ;;  %v1941_v1 = vsel %vm1938_vm8, 1.0, %v2841_v54 }
 0x9d7   : > { %v2003_v46 = vmul.f32 %v2000_v56, %v1965_v19  ;;  %v1971_v55 = vadd.f32 %v2735_v40, %v1970_v61  ;;  %v1940_v56 = vsel %vm1937_vm7, 1.0, %v2841_v54 }
 0x9d8   : > { %v2737_v3 = vpop.eup %2736  ;;  %2742 = vpow2.f32 %v2034_v60 }
 0x9d9   : > { %v2006_v62 = vadd.f32 1.4214138, %v2003_v46  ;;  %v1983_v7 = vmul.f32 %v2737_v3, %v1951_v48  ;;  %v1975_v9 = vsel %vm1974_vm15, %v2735_v40, %v1971_v55  ;;  %vm1988_vm1 = vweird.f32 %v2737_v3  ;;  %v2739_v43 = vpop.eup %2738 }
 0x9da   : > { %v1980_v10 = vsel %vm1977_vm0, %v1979_v6, %v1975_v9  ;;  %vm1989_vm3 = vmor %vm1987_vm2, %vm1988_vm1  ;;  %v2741_v53 = vpop.eup %2740  ;;  %v1931_v6 = vmul.f32 0.5, %v3389_v17  ;;  %v2653_v17 = vld [vmem:[%s3561_s8] ss:$0 sm:$0xff] }
 0x9db   : > { %v2009_v8 = vmul.f32 %v2006_v62, %v1965_v19  ;;  %v1984_v14 = vsub.f32 1.0, %v1983_v7  ;;  %v1998_v2 = vmul.f32 1.0614054, %v1980_v10  ;;  %v1932_v7 = vmul.f32 0.5, %v3397_v11 }
 0x9dd   : > { %v2012_v34 = vadd.f32 -0.28449672, %v2009_v8  ;;  %v1985_v20 = vmul.f32 %v2737_v3, %v1984_v14  ;;  %v2001_v23 = vadd.f32 -1.4531521, %v1998_v2  ;;  %v1942_v14 = vsel %vm1939_vm9, 1.0, %v2841_v54 }
 0x9de   : > { %v2743_v62 = vpop.eup %2742 }
 0x9df   : > { %v2015_v25 = vmul.f32 %v2012_v34, %v1965_v19  ;;  %v1986_v26 = vadd.f32 %v2737_v3, %v1985_v20  ;;  %v2004_v13 = vmul.f32 %v2001_v23, %v1980_v10  ;;  %v1933_v34 = vmul.f32 0.5, %v3408_v29 }
 0x9e1   : > { %v2018_v24 = vadd.f32 0.2548296, %v2015_v25  ;;  %v1990_v28 = vsel %vm1989_vm3, %v2737_v3, %v1986_v26  ;;  %v2007_v30 = vadd.f32 1.4214138, %v2004_v13 }
 0x9e2   : > { %v1995_v38 = vsel %vm1992_vm6, %v1994_v22, %v1990_v28 }
 0x9e3   : > { %v2021_v39 = vmul.f32 %v2018_v24, %v1965_v19  ;;  %v1999_v42 = vmul.f32 1.0614054, %v1995_v38  ;;  %v2010_v45 = vmul.f32 %v2007_v30, %v1980_v10 }
 0x9e5   : > { %v2002_v47 = vadd.f32 -1.4531521, %v1999_v42  ;;  %v2036_v32 = vmul.f32 %v2739_v43, %v2021_v39  ;;  %v2013_v44 = vadd.f32 -0.28449672, %v2010_v45 }
 0x9e7   : > { %v2005_v0 = vmul.f32 %v2002_v47, %v1995_v38  ;;  %v2016_v48 = vmul.f32 %v2013_v44, %v1980_v10  ;;  %v2039_v49 = vsub.f32 1.0, %v2036_v32 }
 0x9e9   : > { %v2008_v40 = vadd.f32 1.4214138, %v2005_v0  ;;  %v2019_v51 = vadd.f32 0.2548296, %v2016_v48  ;;  %v2042_v59 = vmul.f32 %v2039_v49, %v1940_v56 }
 0x9eb   : > { %v2011_v52 = vmul.f32 %v2008_v40, %v1995_v38  ;;  %v2022_v19 = vmul.f32 %v2019_v51, %v1980_v10  ;;  %v2045_v3 = vadd.f32 1.0, %v2042_v59 }
 0x9ed   : > { %v2014_v57 = vadd.f32 -0.28449672, %v2011_v52  ;;  %v2037_v61 = vmul.f32 %v2741_v53, %v2022_v19  ;;  %v2048_v8 = vmul.f32 %v2045_v3, %v1931_v6 }
 0x9ef   : > { %v2017_v41 = vmul.f32 %v2014_v57, %v1995_v38  ;;  %v2040_v63 = vsub.f32 1.0, %v2037_v61 }
 0x9f1   : > { %v2020_v46 = vadd.f32 0.2548296, %v2017_v41  ;;  %v2043_v18 = vmul.f32 %v2040_v63, %v1941_v1 }
 0x9f3   : > { %v2023_v55 = vmul.f32 %v2020_v46, %v1995_v38  ;;  %v2046_v4 = vadd.f32 1.0, %v2043_v18 }
 0x9f5   : > { %v2038_v9 = vmul.f32 %v2743_v62, %v2023_v55  ;;  %v2049_v10 = vmul.f32 %v2046_v4, %v1932_v7 }
 0x9f7   : > { %v2051_v27 = vpack.c.bf16 %v2049_v10, %v2048_v8  ;;  %v2041_v58 = vsub.f32 1.0, %v2038_v9 }
 0x9f9   : > { %2129 = vmatmul.bf16.vlgmr.msra.gmra.mxu2 %v2051_v27  ;;  %v2044_v2 = vmul.f32 %v2041_v58, %v1942_v14 }
 0x9fb   : > { %v2047_v16 = vadd.f32 1.0, %v2044_v2 }
 0x9fd   : > { %v2050_v20 = vmul.f32 %v2047_v16, %v1933_v34 }
 0x9ff   : > { %v2052_v21 = vpack.c.bf16 %v2050_v20, %v2050_v20 }
 0xa09   : > { %2134 = vmatmul.bf16.gmra.mxu2 %v2052_v21 }
 0xa7c   : > { %v2130_v11 = vpop.f32.mrf.mxu2 }
 0xa7d   : > { %v2131_v23 = vadd.f32 %v2653_v17, %v2130_v11 }
 0xa7f   : > { %v2139_v25 = vadd.f32 %v2131_v23, %v3346_v5 }
 0xa81   : > { %2142 = vst.msk [vmem:[#allocation2] sm:$0xff] %vm968_vm4, %v2139_v25 }
 0xa84   : > { %v2132_v35 = vpop.f32.mrf.mxu2 }
 0xa85   : > { %v2133_v15 = vadd.f32 %v2653_v17, %v2132_v35 }
 0xa87   : > { %v2140_v26 = vadd.f32 %v2133_v15, %v3350_v50 }
 0xa89   : > { %2143 = vst.msk [vmem:[#allocation2 + $0x8] sm:$0xff] %vm968_vm4, %v2140_v26 }
 0xa8c   : > { %v2135_v29 = vpop.f32.mrf.mxu2 }
 0xa8d   : > { %v2136_v13 = vadd.f32 %v2653_v17, %v2135_v29 }
 0xa8f   : > { %v2141_v22 = vadd.f32 %v2136_v13, %v3354_v12 }
 0xa90   : > { %2148 = sbr.rel (%p2558_p5) target bundleno = 3269 (0xcc5), region = 120 }
 0xa91   : > { %2144 = vst.msk [vmem:[#allocation2 + $0x10] sm:$0x3] %vm975_vm5, %v2141_v22 }
 0xa94   : > { %v2137_v24 = vpop.f32.mrf.mxu2 }
 0xa95   : > { %v2149_v5 = vsel %vm968_vm4, %v2139_v25, 0.0  ;;  %vm2161_vm10 = vcmask 1046528   ;;  %v2162_v28 = vrot.slane %v2140_v26, 1  ;;  %v2163_v33 = vrot.slane %v2141_v22, 1  ;;  %v2602_v56 = vld [vmem:[%s3518_s19 + $0x8] sm:$0xff]  ;;  %v2601_v57 = vld [vmem:[%s3518_s19] sm:$0xff] }
 0xa96   : > { %v2150_v30 = vrot.slane %v2149_v5, 4  ;;  %vm2157_vm11 = vcmask 253952   ;;  %2238 = vmatpush.bf16.msra.mxu0 %v2602_v56  ;;  %v2604_v59 = vld [vmem:[%s3520_s21 + $0x8] sm:$0xff]  ;;  %v2747_v6 = vld [vmem:[%s3516_s17] ss:$0 sm:$0xff] }
 0xa97   : > { %v2164_v50 = vsel %vm2161_vm10, %v2162_v28, %v2163_v33  ;;  %2276 = vmatpush.bf16.msra.mxu1 %v2604_v59  ;;  %v2603_v27 = vld [vmem:[%s3520_s21] sm:$0xff] }
 0xa98   : > { %v2151_v38 = vadd.f32 %v2150_v30, %v2149_v5  ;;  %v2166_v39 = vsel %vm968_vm4, %v2164_v50, 0.0  ;;  %v2749_v58 = vld [vmem:[%s3563_s0] ss:$0 sm:$0xff] }
 0xa99   : > { %v2167_v42 = vrot.slane %v2166_v39, 4  ;;  %v2750_v20 = vld [vmem:[%s3564_s25] ss:$0 sm:$0xff] }
 0xa9a   : > { %v2152_v36 = vrot.slane %v2151_v38, 2  ;;  %2239 = vmatpush.bf16.msra.mxu0 %v2601_v57 }
 0xa9b   : > { %v2168_v12 = vadd.f32 %v2167_v42, %v2166_v39  ;;  %2277 = vmatpush.bf16.msra.mxu1 %v2603_v27 }
 0xa9c   : > { %v2153_v43 = vadd.f32 %v2152_v36, %v2151_v38 }
 0xa9d   : > { %v2169_v47 = vrot.slane %v2168_v12, 2 }
 0xa9e   : > { %v2154_v45 = vrot.slane %v2153_v43, 1 }
 0xa9f   : > { %v2170_v44 = vadd.f32 %v2169_v47, %v2168_v12 }
 0xaa0   : > { %v2155_v32 = vadd.f32 %v2154_v45, %v2153_v43 }
 0xaa1   : > { %v2171_v0 = vrot.slane %v2170_v44, 1 }
 0xaa2   : > { %v2156_v37 = vmul.f32 0.125, %v2155_v32 }
 0xaa3   : > { %v2172_v48 = vadd.f32 %v2171_v0, %v2170_v44 }
 0xaa4   : > { %2158 = vst.msk [vmem:[#allocation4] sm:$0x1] %vm2157_vm11, %v2156_v37 }
 0xaa5   : > { %v2173_v40 = vmul.f32 0.125, %v2172_v48 }
 0xaa7   : > { %2174 = vst.msk [vmem:[#allocation4 + $0x1] sm:$0x1] %vm2157_vm11, %v2173_v40 }
 0xaae   : > { %v2175_v49 = vld [vmem:[#allocation4] sm:$0x3] }
 0xaaf   : > { %v2178_v51 = vsel %vm975_vm5, %v2175_v49, 0.0 }
 0xab0   : > { %2179 = vadd.xlane.f32.xlu0 %v2178_v51 }
 0xb23   : > { %v2180_v60 = vpop.xlane.xlu0 %2179 }
 0xb24   : > { %v2181_v52 = vmul.f32 %v2180_v60, %v3065_v31 }
 0xb26   : > { %v2182_v19 = vsub.f32 %v2175_v49, %v2181_v52 }
 0xb28   : > { %v2183_v53 = vmul.f32 %v2182_v19, %v2182_v19 }
 0xb2a   : > { %v2184_v54 = vsel %vm975_vm5, %v2183_v53, 0.0 }
 0xb2b   : > { %2185 = vadd.xlane.f32.xlu0 %v2184_v54 }
 0xb9e   : > { %v2186_v61 = vpop.xlane.xlu0 %2185 }
 0xb9f   : > { %v2187_v41 = vmul.f32 %v2186_v61, %v3065_v31  ;;  %v2748_v31 = vld [vmem:[%s3562_s30] ss:$0 sm:$0xff] }
 0xba1   : > { %v2188_v63 = vadd.f32 1e-06, %v2187_v41 }
 0xba3   : > { %2751 = vrsqrt.f32 %v2188_v63  ;;  %vm2195_vm13 = vweird.f32 %v2188_v63 }
 0xba9   : > { %v2752_v1 = vpop.eup %2751 }
 0xbaa   : > { %v2190_v46 = vmul.f32 %v2752_v1, %v2188_v63  ;;  %vm2196_vm12 = vweird.f32 %v2752_v1 }
 0xbab   : > { %vm2197_vm14 = vmor %vm2195_vm13, %vm2196_vm12 }
 0xbac   : > { %v2191_v3 = vmul.f32 %v2752_v1, %v2190_v46 }
 0xbae   : > { %v2192_v18 = vmul.f32 0.5, %v2191_v3 }
 0xbb0   : > { %v2193_v55 = vsub.f32 1.5, %v2192_v18 }
 0xbb2   : > { %v2194_v62 = vmul.f32 %v2752_v1, %v2193_v55 }
 0xbb4   : > { %v2198_v7 = vsel %vm2197_vm14, %v2752_v1, %v2194_v62 }
 0xbb5   : > { %v2199_v4 = vmul.f32 %v2198_v7, %v2182_v19 }
 0xbb7   : > { %v2203_v9 = vmul.f32 %v2747_v6, %v2199_v4 }
 0xbb9   : > { %v2207_v8 = vadd.f32 %v2748_v31, %v2203_v9 }
 0xbbb   : > { %v2208_v10 = vpack.c.bf16 %v2207_v8, %v2207_v8 }
 0xbbd   : > { %2567 = vmatmul.msk.bf16.vlgmr.msra.gmra.mxu0 %vm968_vm4, %v2208_v10 }
 0xc3a   : > { %v2241_v14 = vpop.f32.mrf.mxu0 }
 0xc3b   : > { %v2242_v2 = vadd.f32 %v2749_v58, %v2241_v14 }
 0xc3d   : > { %2245 = vst.msk [vmem:[#allocation5] sm:$0x3] %vm975_vm5, %v2242_v2  ;;  %v2246_v16 = vpack.c.bf16 %v2242_v2, %v2242_v2 }
 0xc3f   : > { %2576 = vmatmul.msk.bf16.vlgmr.msra.gmra.mxu1 %vm968_vm4, %v2246_v16 }
 0xc42   : > { %v2243_v34 = vpop.f32.mrf.mxu0 }
 0xcbc   : > { %v2279_v21 = vpop.f32.mrf.mxu1 }
 0xcbd   : > { %v2280_v17 = vadd.f32 %v2750_v20, %v2279_v21 }
 0xcbf   : > { %2283 = vst.msk [vmem:[#allocation7] sm:$0x3] %vm975_vm5, %v2280_v17 }
 0xcc4   : > { %v2281_v11 = vpop.f32.mrf.mxu1 }
 0xcc5 PF: > { %p2613_p6 = scmp.eq.s32.totalorder %s2975_s26, 1  ;;  %s2842_s28 = smov [#allocation5]  }
 0xcc6   : > { %s2290_s4 = sshll.u32 %s2842_s28, 4  ;;  %s3565_s9 = sld [smem:[#allocation25_spill]]  ;;  %s2291_s4 = int_to_ptr.vmem [resolvable:$true] %s2290_s4 }
 0xcc7   : > { %s3566_s30 = sld [smem:[#allocation26_spill]]  ;;  %s2843_s3 = smov [#allocation7]  }
 0xcc8   : > { %s2302_s1 = sshll.u32 %s2843_s3, 4  ;;  %s2303_s1 = int_to_ptr.vmem [resolvable:$true] %s2302_s1 }
 0xccc   : > { %s2292_s29 = sshll.u32 %s3565_s9, 4  ;;  %s2293_s29 = int_to_ptr.hbm [resolvable:$true] %s2292_s29 }
 0xccd   : > { %2606 = dma.vmem_to_hbm [thread:$0]  (%p2613_p6), %s2291_s4, 32, %s2293_s29, [#allocation6]  }
 0xcce   : > { %s2304_s23 = sshll.u32 %s3566_s30, 4  ;;  %s2305_s23 = int_to_ptr.hbm [resolvable:$true] %s2304_s23 }
 0xccf   : > { %2608 = dma.vmem_to_hbm [thread:$0]  (%p2613_p6), %s2303_s1, 32, %s2305_s23, [#allocation8]  }
 0xcd0   : > { %2814 = dma.done.wait (%p2613_p6), [#allocation6], 32  }
 0xcd1   : > { %2816 = vsyncadd (%p2613_p6), [#allocation6], 4294967264 }
 0xcd2   : > { %2818 = dma.done.wait (%p2613_p6), [#allocation8], 32  }
 0xcd3   : > { %2820 = vsyncadd (%p2613_p6), [#allocation8], 4294967264 }
 0xcd4 PF: > { %s3567_s5 = sld [smem:[#allocation11_spill]] }
 0xcda   : > { %s37_s5 = sadd.s32 1, %s3567_s5  }
 0xcdb   : > { %p34_p7 = scmp.ge.s32.totalorder %s37_s5, 4  }
 0xcdd   :  { %36 = sbr.rel (!%p34_p7) target bundleno = 18 (0x12), region = 189 }
 0xce2   :  { %2323 = vsyncpa [#allocation6], 1 }
 0xce3   :  { %2325 = vsyncpa [#allocation6 + $0x1], 1 }
 0xce4   :  { %2326 = vsyncpa [#allocation8], 1 }

</bundles_post_ra>
